<compile_context>
chip_gen: v5e
topology: v5e:2x2
jax: 0.10.0
libtpu: 0.0.40
codegen_flags: <defaults>
</compile_context>

<pallas_src>
import functools
import math

import jax
import jax.numpy as jnp
from jax import lax
from jax.experimental import pallas as pl
from jax.experimental.pallas import tpu as pltpu


def _layer_norm(v, gamma, beta, eps):
    # Matches the module's custom LayerNorm: mean / UNBIASED std over last dim,
    # a*(x-mean)/(std+eps)+b, eps=1e-6.
    n = v.shape[-1]
    mean = jnp.mean(v, axis=-1, keepdims=True)
    centered = v - mean
    var = jnp.sum(centered * centered, axis=-1, keepdims=True) / (n - 1)
    std = jnp.sqrt(var)
    return gamma * centered / (std + eps) + beta


def _gelu_tanh(v):
    c = math.sqrt(2.0 / math.pi)
    return 0.5 * v * (1.0 + jnp.tanh(c * (v + 0.044715 * v * v * v)))


def transformer_block_kernel(
    x_ref, bias_ref,
    ln1_g_ref, ln1_b_ref,
    wqkv_ref, bqkv_ref,
    wo_ref, bo_ref,
    ln2_g_ref, ln2_b_ref,
    w1_ref, b1_ref, w2_ref, b2_ref,
    o_ref,
    ctx_ref, h2_ref, acc_ref,
    *, num_heads, eps):
    f32 = jnp.float32
    c = pl.program_id(1)                 # Dff-chunk index (reduction axis, last)
    n_c = pl.num_programs(1)
    cdt = wqkv_ref.dtype                 # MXU compute dtype (bf16 or f32), no per-step upcast

    # ---------------- sublayer 1 (attention) + LN2: only on the first chunk step ----
    @pl.when(c == 0)
    def _attention_and_ln2():
        x = x_ref[0].astype(f32)         # (S, H) -- one batch element per grid step
        S, H = x.shape
        dk = H // num_heads
        scale = 1.0 / math.sqrt(dk)

        h = _layer_norm(x, ln1_g_ref[...], ln1_b_ref[...], eps)

        # Fused QKV projection: one (S,H) @ (H,3H) matmul.
        qkv = jnp.dot(h.astype(cdt), wqkv_ref[...],
                      preferred_element_type=f32) + bqkv_ref[...]
        q = qkv[:, :H] * scale           # fold 1/sqrt(dk) into q once (S*H muls)
        k = qkv[:, H:2 * H]
        v = qkv[:, 2 * H:]

        bias = bias_ref[0]               # (S, S) additive mask bias, precomputed in wrapper

        # Per-head attention (num_heads is small & static); each head's context is
        # written into the (S, H) ctx scratch so Wo is applied as a single K=H matmul.
        for hh in range(num_heads):
            sl = slice(hh * dk, (hh + 1) * dk)
            qh = q[:, sl].astype(cdt)
            kh = k[:, sl].astype(cdt)
            vh = v[:, sl].astype(cdt)
            scores = lax.dot_general(qh, kh, (((1,), (1,)), ((), ())),
                                     preferred_element_type=f32) + bias   # (S, S)
            m = jnp.max(scores, axis=-1, keepdims=True)
            e = jnp.exp(scores - m)
            ctx = jnp.dot(e.astype(cdt), vh, preferred_element_type=f32)  # (S, dk)
            # Normalize AFTER P@V: S*dk muls + EUP reciprocal instead of S^2 divides.
            inv = pl.reciprocal(jnp.sum(e, axis=-1, keepdims=True), approx=True)
            ctx_ref[:, sl] = ctx * inv

        attn = jnp.dot(ctx_ref[...].astype(cdt), wo_ref[...],
                       preferred_element_type=f32) + bo_ref[...]
        x1 = x + attn                    # residual (dropout = identity)

        acc_ref[...] = x1                # FFN accumulator starts at the residual baseline
        h2_ref[...] = _layer_norm(x1, ln2_g_ref[...], ln2_b_ref[...], eps)

    # ---------------- sublayer 2: one Dff chunk per grid step (W1/W2 streamed) -------
    ff = jnp.dot(h2_ref[...].astype(cdt), w1_ref[...],
                 preferred_element_type=f32) + b1_ref[...]                # (S, ffc)
    ff = _gelu_tanh(ff)
    acc_ref[...] += jnp.dot(ff.astype(cdt), w2_ref[...],
                            preferred_element_type=f32)                   # (S, H)

    @pl.when(c == n_c - 1)
    def _write():
        o_ref[0] = (acc_ref[...] + b2_ref[...]).astype(o_ref.dtype)


def transformer_block(x, mask, params, *, num_heads, eps=1e-6,
                      weights_dtype=None, ff_chunk=512):
    """
    x:      [batch, seq, hidden]
    mask:   [batch, 1, seq, seq] or [batch, seq, seq]; 0 => masked position
    params: PyTorch-convention weights ([out, in]) and biases ([out]):
            ln1_g, ln1_b, wq, bq, wk, bk, wv, bv, wo, bo, ln2_g, ln2_b, w1, b1, w2, b2
    weights_dtype: optional dtype (e.g. jnp.bfloat16) the big matrices are cast to
            ONCE in the wrapper (native MXU rate); biases/LN params stay f32.
    returns [batch, seq, hidden] (same dtype as x)
    """
    B, S, H = x.shape
    Dff = params["w1"].shape[0]
    assert H % num_heads == 0

    # ---- additive attention bias, computed ONCE (not per head / per grid step) ----
    if mask.ndim == 4:
        mask = mask[:, 0]
    bias = jnp.where(mask == 0, jnp.float32(-1e9), jnp.float32(0.0))
    bias = jnp.broadcast_to(bias, (B, S, S))

    wdt = jnp.dtype(weights_dtype) if weights_dtype is not None else jnp.dtype(params["wq"].dtype)

    def w_io(name):                      # [out, in] -> [in, out] so the kernel does x @ W
        return params[name].T.astype(wdt)

    def b_row(name, dim):
        return params[name].reshape(1, dim).astype(jnp.float32)

    # Fused QKV weight / bias.
    wqkv = jnp.concatenate([w_io("wq"), w_io("wk"), w_io("wv")], axis=1)      # (H, 3H)
    bqkv = jnp.concatenate([params["bq"], params["bk"], params["bv"]]
                           ).reshape(1, 3 * H).astype(jnp.float32)

    ln1_g = params["ln1_g"].reshape(1, H).astype(jnp.float32)
    ln1_b = params["ln1_b"].reshape(1, H).astype(jnp.float32)
    ln2_g = params["ln2_g"].reshape(1, H).astype(jnp.float32)
    ln2_b = params["ln2_b"].reshape(1, H).astype(jnp.float32)
    wo, bo = w_io("wo"), b_row("bo", H)
    w1, b1 = w_io("w1"), b_row("b1", Dff)                                     # (H, Dff), (1, Dff)
    w2, b2 = w_io("w2"), b_row("b2", H)                                       # (Dff, H), (1, H)

    # ---- Dff chunking (streams W1/W2 instead of keeping them resident) ----
    ffc = min(ff_chunk, Dff)
    if Dff % ffc != 0:
        ffc = Dff            # TODO(synk): pad Dff to a multiple of the chunk instead
    n_chunks = Dff // ffc

    def resident(shape):     # constant block index -> stays in VMEM across grid steps
        return pl.BlockSpec(shape, lambda b, c: (0,) * len(shape))
        # NOTE: could add pipeline_mode=pl.Buffered(1) here to avoid double-buffering
        # the resident weights (reclaims ~half their VMEM at BERT-base/large sizes).

    in_specs = [
        pl.BlockSpec((1, S, H), lambda b, c: (b, 0, 0)),   # x (one batch element)
        pl.BlockSpec((1, S, S), lambda b, c: (b, 0, 0)),   # additive mask bias
        resident((1, H)), resident((1, H)),                # LayerNorm 1
        resident((H, 3 * H)), resident((1, 3 * H)),        # fused Wqkv, bqkv
        resident((H, H)), resident((1, H)),                # Wo, bo
        resident((1, H)), resident((1, H)),                # LayerNorm 2
        pl.BlockSpec((H, ffc), lambda b, c: (0, c)),       # W1 chunk (streamed)
        pl.BlockSpec((1, ffc), lambda b, c: (0, c)),       # b1 chunk
        pl.BlockSpec((ffc, H), lambda b, c: (c, 0)),       # W2 chunk (streamed)
        resident((1, H)),                                  # b2
    ]

    itemw = jnp.dtype(wdt).itemsize
    itemx = jnp.dtype(x.dtype).itemsize
    flops = int(2 * B * S * (4 * H * H + 2 * S * H + 2 * H * Dff))
    transcendentals = int(B * (num_heads * S * S + S * Dff))
    bytes_accessed = int(
        B * S * H * itemx * 2                               # x in + out
        + B * S * S * 4                                     # mask bias
        + (4 * H * H + 2 * H * Dff) * itemw                 # weight matrices
        + (3 * H + 2 * H + Dff + 4 * H) * 4)                # biases + LN params

    kernel = functools.partial(transformer_block_kernel, num_heads=num_heads, eps=eps)

    return pl.pallas_call(
        kernel,
        out_shape=jax.ShapeDtypeStruct((B, S, H), x.dtype),
        grid_spec=pltpu.PrefetchScalarGridSpec(
            num_scalar_prefetch=0,
            grid=(B, n_chunks),
            in_specs=in_specs,
            out_specs=pl.BlockSpec((1, S, H), lambda b, c: (b, 0, 0)),
            scratch_shapes=[
                pltpu.VMEM((S, H), jnp.float32),   # per-head ctx, concatenated
                pltpu.VMEM((S, H), jnp.float32),   # h2 = LN2(x + attn)
                pltpu.VMEM((S, H), jnp.float32),   # FFN / output accumulator
            ]),
        compiler_params=pltpu.CompilerParams(
            dimension_semantics=("parallel", "arbitrary"),   # batch parallel, Dff reduction
            vmem_limit_bytes=64 * 1024 * 1024),
        cost_estimate=pl.CostEstimate(flops=flops,
                                      transcendentals=transcendentals,
                                      bytes_accessed=bytes_accessed),
    )(x, bias, ln1_g, ln1_b, wqkv, bqkv, wo, bo, ln2_g, ln2_b, w1, b1, w2, b2)


# ----------------------------- pure-JAX reference -----------------------------
def ref_transformer_block(x, mask4, p, num_heads, eps=1e-6):
    B, S, H = x.shape
    dk = H // num_heads

    def ln(v, g, b):
        mean = v.mean(-1, keepdims=True)
        var = jnp.sum((v - mean) ** 2, -1, keepdims=True) / (H - 1)  # unbiased std
        std = jnp.sqrt(var)
        return g * (v - mean) / (std + eps) + b

    def lin(v, w, b):                      # PyTorch nn.Linear: x @ W.T + b
        return jnp.einsum("...i,oi->...o", v, w) + b

    h = ln(x, p["ln1_g"], p["ln1_b"])
    q = lin(h, p["wq"], p["bq"]).reshape(B, S, num_heads, dk).transpose(0, 2, 1, 3)
    k = lin(h, p["wk"], p["bk"]).reshape(B, S, num_heads, dk).transpose(0, 2, 1, 3)
    v = lin(h, p["wv"], p["bv"]).reshape(B, S, num_heads, dk).transpose(0, 2, 1, 3)
    scores = jnp.einsum("bhqd,bhkd->bhqk", q, k) / math.sqrt(dk)
    scores = jnp.where(mask4 == 0, jnp.float32(-1e9), scores)
    p_attn = jax.nn.softmax(scores, axis=-1)
    ctx = jnp.einsum("bhqk,bhkd->bhqd", p_attn, v)
    ctx = ctx.transpose(0, 2, 1, 3).reshape(B, S, H)
    x = x + lin(ctx, p["wo"], p["bo"])

    h2 = ln(x, p["ln2_g"], p["ln2_b"])
    ff = lin(h2, p["w1"], p["b1"])
    ff = 0.5 * ff * (1.0 + jnp.tanh(math.sqrt(2.0 / math.pi) * (ff + 0.044715 * ff ** 3)))
    x = x + lin(ff, p["w2"], p["b2"])
    return x


if __name__ == "__main__":
    jax.config.update("jax_default_matmul_precision", "highest")

    batch, seq, hidden, heads = 2, 8, 64, 4
    ff_hidden = 4 * hidden                      # 256 -> 2 chunks of 128

    key = jax.random.PRNGKey(0)
    (kx, kmask, kln1g, kln1b, kln2g, kln2b,
     kq, kk, kv, ko, k1, k2) = jax.random.split(key, 12)

    def linear_params(k, fan_in, fan_out):
        kw, kb = jax.random.split(k)
        bound = 1.0 / math.sqrt(fan_in)
        w = jax.random.uniform(kw, (fan_out, fan_in), minval=-bound, maxval=bound,
                               dtype=jnp.float32)
        b = jax.random.uniform(kb, (fan_out,), minval=-bound, maxval=bound,
                               dtype=jnp.float32)
        return w, b

    wq, bq = linear_params(kq, hidden, hidden)
    wk, bk = linear_params(kk, hidden, hidden)
    wv, bv = linear_params(kv, hidden, hidden)
    wo, bo = linear_params(ko, hidden, hidden)
    w1, b1 = linear_params(k1, hidden, ff_hidden)
    w2, b2 = linear_params(k2, ff_hidden, hidden)

    params = dict(
        ln1_g=1.0 + 0.1 * jax.random.normal(kln1g, (hidden,), dtype=jnp.float32),
        ln1_b=0.1 * jax.random.normal(kln1b, (hidden,), dtype=jnp.float32),
        ln2_g=1.0 + 0.1 * jax.random.normal(kln2g, (hidden,), dtype=jnp.float32),
        ln2_b=0.1 * jax.random.normal(kln2b, (hidden,), dtype=jnp.float32),
        wq=wq, bq=bq, wk=wk, bk=bk, wv=wv, bv=bv, wo=wo, bo=bo,
        w1=w1, b1=b1, w2=w2, b2=b2,
    )

    x = jax.random.normal(kx, (batch, seq, hidden), dtype=jnp.float32)

    # BERT-style key-padding mask: [batch, 1, seq, seq], 0 = masked key position.
    key_valid = jax.random.uniform(kmask, (batch, seq)) > 0.25
    key_valid = key_valid.at[:, 0].set(True)            # keep at least one valid key
    mask = jnp.broadcast_to(key_valid[:, None, None, :],
                            (batch, 1, seq, seq)).astype(jnp.int32)

    ref = ref_transformer_block(x, mask, params, num_heads=heads)

    # f32-weight path, with the Dff-chunked FFN exercised (2 chunks of 128).
    out = transformer_block(x, mask, params, num_heads=heads, ff_chunk=128)
    out = jax.block_until_ready(out)
    assert out.shape == (batch, seq, hidden)
    assert jnp.allclose(out, ref, atol=2e-3, rtol=2e-3), "f32 kernel mismatch vs reference"

    # bf16-weight path (weights cast ONCE in the wrapper, native MXU rate).
    out_bf16 = transformer_block(x, mask, params, num_heads=heads,
                                 weights_dtype=jnp.bfloat16)
    out_bf16 = jax.block_until_ready(out_bf16)
    assert jnp.max(jnp.abs(out_bf16.astype(jnp.float32) - ref)) < 0.25, \
        "bf16 kernel diverged from reference"

    print("KERNEL_OK")
</pallas_src>

<mosaic_0001>
module attributes {stable_mosaic.version = 11 : i64} {
  func.func @transformer_block_kernel(%arg0: i32, %arg1: i32, %arg2: memref<1x8x64xf32, #tpu.memory_space<vmem>>, %arg3: memref<1x8x8xf32, #tpu.memory_space<vmem>>, %arg4: memref<1x64xf32, #tpu.memory_space<vmem>>, %arg5: memref<1x64xf32, #tpu.memory_space<vmem>>, %arg6: memref<64x192xf32, #tpu.memory_space<vmem>>, %arg7: memref<1x192xf32, #tpu.memory_space<vmem>>, %arg8: memref<64x64xf32, #tpu.memory_space<vmem>>, %arg9: memref<1x64xf32, #tpu.memory_space<vmem>>, %arg10: memref<1x64xf32, #tpu.memory_space<vmem>>, %arg11: memref<1x64xf32, #tpu.memory_space<vmem>>, %arg12: memref<64x128xf32, #tpu.memory_space<vmem>>, %arg13: memref<1x128xf32, #tpu.memory_space<vmem>>, %arg14: memref<128x64xf32, #tpu.memory_space<vmem>>, %arg15: memref<1x64xf32, #tpu.memory_space<vmem>>, %arg16: memref<1x8x64xf32, #tpu.memory_space<vmem>>, %arg17: memref<8x64xf32, #tpu.memory_space<vmem>>, %arg18: memref<8x64xf32, #tpu.memory_space<vmem>>, %arg19: memref<8x64xf32, #tpu.memory_space<vmem>>) attributes {dimension_semantics = [#tpu.dimension_semantics<parallel>, #tpu.dimension_semantics<arbitrary>], iteration_bounds = array<i64: 2, 2>, scalar_prefetch = 0 : i64, scratch_operands = 3 : i64, tpu.core_type = #tpu.core_type<tc>, window_params = [{transform_indices = @transform_0, window_bounds = array<i64: 1, 8, 64>}, {transform_indices = @transform_1, window_bounds = array<i64: 1, 8, 8>}, {pipeline_mode = #tpu.pipeline_mode<synchronous>, transform_indices = @transform_2, window_bounds = array<i64: 1, 64>}, {pipeline_mode = #tpu.pipeline_mode<synchronous>, transform_indices = @transform_3, window_bounds = array<i64: 1, 64>}, {pipeline_mode = #tpu.pipeline_mode<synchronous>, transform_indices = @transform_4, window_bounds = array<i64: 64, 192>}, {pipeline_mode = #tpu.pipeline_mode<synchronous>, transform_indices = @transform_5, window_bounds = array<i64: 1, 192>}, {pipeline_mode = #tpu.pipeline_mode<synchronous>, transform_indices = @transform_6, window_bounds = array<i64: 64, 64>}, {pipeline_mode = #tpu.pipeline_mode<synchronous>, transform_indices = @transform_7, window_bounds = array<i64: 1, 64>}, {pipeline_mode = #tpu.pipeline_mode<synchronous>, transform_indices = @transform_8, window_bounds = array<i64: 1, 64>}, {pipeline_mode = #tpu.pipeline_mode<synchronous>, transform_indices = @transform_9, window_bounds = array<i64: 1, 64>}, {transform_indices = @transform_10, window_bounds = array<i64: 64, 128>}, {transform_indices = @transform_11, window_bounds = array<i64: 1, 128>}, {transform_indices = @transform_12, window_bounds = array<i64: 128, 64>}, {pipeline_mode = #tpu.pipeline_mode<synchronous>, transform_indices = @transform_13, window_bounds = array<i64: 1, 64>}, {transform_indices = @transform_14, window_bounds = array<i64: 1, 8, 64>}]} {
    %c0_i32 = arith.constant 0 : i32
    %0 = arith.cmpi eq, %arg1, %c0_i32 : i32
    %1 = arith.extui %0 : i1 to i32
    %c0_i32_0 = arith.constant 0 : i32
    %2 = arith.cmpi ne, %1, %c0_i32_0 : i32
    scf.if %2 {
      %c0_18 = arith.constant 0 : index
      %c0_19 = arith.constant 0 : index
      %c0_20 = arith.constant 0 : index
      %30 = vector.load %arg2[%c0_18, %c0_19, %c0_20] : memref<1x8x64xf32, #tpu.memory_space<vmem>>, vector<1x8x64xf32>
      %31 = vector.shape_cast %30 : vector<1x8x64xf32> to vector<8x64xf32>
      %c0_21 = arith.constant 0 : index
      %c0_22 = arith.constant 0 : index
      %32 = vector.load %arg4[%c0_21, %c0_22] : memref<1x64xf32, #tpu.memory_space<vmem>>, vector<1x64xf32>
      %c0_23 = arith.constant 0 : index
      %c0_24 = arith.constant 0 : index
      %33 = vector.load %arg5[%c0_23, %c0_24] : memref<1x64xf32, #tpu.memory_space<vmem>>, vector<1x64xf32>
      %cst_25 = arith.constant dense<0.000000e+00> : vector<8xf32>
      %34 = vector.multi_reduction <add>, %31, %cst_25 [1] : vector<8x64xf32> to vector<8xf32>
      %35 = vector.shape_cast %34 : vector<8xf32> to vector<8x1xf32>
      %cst_26 = arith.constant 6.400000e+01 : f32
      %36 = vector.broadcast %cst_26 : f32 to vector<8x1xf32>
      %37 = arith.divf %35, %36 : vector<8x1xf32>
      %38 = vector.broadcast %37 : vector<8x1xf32> to vector<8x64xf32>
      %39 = arith.subf %31, %38 : vector<8x64xf32>
      %40 = arith.mulf %39, %39 : vector<8x64xf32>
      %cst_27 = arith.constant dense<0.000000e+00> : vector<8xf32>
      %41 = vector.multi_reduction <add>, %40, %cst_27 [1] : vector<8x64xf32> to vector<8xf32>
      %42 = vector.shape_cast %41 : vector<8xf32> to vector<8x1xf32>
      %cst_28 = arith.constant 6.300000e+01 : f32
      %43 = vector.broadcast %cst_28 : f32 to vector<8x1xf32>
      %44 = arith.divf %42, %43 : vector<8x1xf32>
      %45 = math.sqrt %44 : vector<8x1xf32>
      %46 = vector.broadcast %32 : vector<1x64xf32> to vector<8x64xf32>
      %47 = arith.mulf %46, %39 : vector<8x64xf32>
      %cst_29 = arith.constant 9.99999997E-7 : f32
      %48 = vector.broadcast %cst_29 : f32 to vector<8x1xf32>
      %49 = arith.addf %45, %48 : vector<8x1xf32>
      %50 = vector.broadcast %49 : vector<8x1xf32> to vector<8x64xf32>
      %51 = arith.divf %47, %50 : vector<8x64xf32>
      %52 = vector.broadcast %33 : vector<1x64xf32> to vector<8x64xf32>
      %53 = arith.addf %51, %52 : vector<8x64xf32>
      %c0_30 = arith.constant 0 : index
      %c0_31 = arith.constant 0 : index
      %54 = vector.load %arg6[%c0_30, %c0_31] : memref<64x192xf32, #tpu.memory_space<vmem>>, vector<64x192xf32>
      %cst_32 = arith.constant dense<0.000000e+00> : vector<8x192xf32>
      %55 = tpu.matmul %53, %54, %cst_32 {dimension_numbers = #tpu.dot_dimension_numbers<[1], [0], [0], [1], [0, 0, 1, 1], [], []>, precision = #tpu.contract_precision<fp32>} : vector<8x64xf32>, vector<64x192xf32>, vector<8x192xf32> -> vector<8x192xf32>
      %c0_33 = arith.constant 0 : index
      %c0_34 = arith.constant 0 : index
      %56 = vector.load %arg7[%c0_33, %c0_34] : memref<1x192xf32, #tpu.memory_space<vmem>>, vector<1x192xf32>
      %57 = vector.broadcast %56 : vector<1x192xf32> to vector<8x192xf32>
      %58 = arith.addf %55, %57 : vector<8x192xf32>
      %59 = vector.extract_strided_slice %58 {offsets = [0, 0], sizes = [8, 64], strides = [1, 1]} : vector<8x192xf32> to vector<8x64xf32>
      %cst_35 = arith.constant 2.500000e-01 : f32
      %60 = vector.broadcast %cst_35 : f32 to vector<8x64xf32>
      %61 = arith.mulf %59, %60 : vector<8x64xf32>
      %62 = vector.extract_strided_slice %58 {offsets = [0, 64], sizes = [8, 64], strides = [1, 1]} : vector<8x192xf32> to vector<8x64xf32>
      %63 = vector.extract_strided_slice %58 {offsets = [0, 128], sizes = [8, 64], strides = [1, 1]} : vector<8x192xf32> to vector<8x64xf32>
      %c0_36 = arith.constant 0 : index
      %c0_37 = arith.constant 0 : index
      %c0_38 = arith.constant 0 : index
      %64 = vector.load %arg3[%c0_36, %c0_37, %c0_38] : memref<1x8x8xf32, #tpu.memory_space<vmem>>, vector<1x8x8xf32>
      %65 = vector.shape_cast %64 : vector<1x8x8xf32> to vector<8x8xf32>
      %66 = vector.extract_strided_slice %61 {offsets = [0, 0], sizes = [8, 16], strides = [1, 1]} : vector<8x64xf32> to vector<8x16xf32>
      %67 = vector.extract_strided_slice %62 {offsets = [0, 0], sizes = [8, 16], strides = [1, 1]} : vector<8x64xf32> to vector<8x16xf32>
      %68 = vector.extract_strided_slice %63 {offsets = [0, 0], sizes = [8, 16], strides = [1, 1]} : vector<8x64xf32> to vector<8x16xf32>
      %cst_39 = arith.constant dense<0.000000e+00> : vector<8x8xf32>
      %69 = tpu.matmul %66, %67, %cst_39 {dimension_numbers = #tpu.dot_dimension_numbers<[1], [1], [0], [0], [0, 0, 1, 0], [], []>, precision = #tpu.contract_precision<fp32>} : vector<8x16xf32>, vector<8x16xf32>, vector<8x8xf32> -> vector<8x8xf32>
      %70 = arith.addf %69, %65 : vector<8x8xf32>
      %cst_40 = arith.constant dense<0xFF800000> : vector<8xf32>
      %71 = vector.multi_reduction <maximumf>, %70, %cst_40 [1] : vector<8x8xf32> to vector<8xf32>
      %72 = vector.shape_cast %71 : vector<8xf32> to vector<8x1xf32>
      %73 = vector.broadcast %72 : vector<8x1xf32> to vector<8x8xf32>
      %74 = arith.subf %70, %73 : vector<8x8xf32>
      %75 = math.exp %74 : vector<8x8xf32>
      %cst_41 = arith.constant dense<0.000000e+00> : vector<8x16xf32>
      %76 = tpu.matmul %75, %68, %cst_41 {dimension_numbers = #tpu.dot_dimension_numbers<[1], [0], [0], [1], [0, 0, 1, 1], [], []>, precision = #tpu.contract_precision<fp32>} : vector<8x8xf32>, vector<8x16xf32>, vector<8x16xf32> -> vector<8x16xf32>
      %cst_42 = arith.constant dense<0.000000e+00> : vector<8xf32>
      %77 = vector.multi_reduction <add>, %75, %cst_42 [1] : vector<8x8xf32> to vector<8xf32>
      %78 = vector.shape_cast %77 : vector<8xf32> to vector<8x1xf32>
      %79 = tpu.reciprocal %78 {approx = true} : vector<8x1xf32> -> vector<8x1xf32>
      %80 = vector.broadcast %79 : vector<8x1xf32> to vector<8x16xf32>
      %81 = arith.mulf %76, %80 : vector<8x16xf32>
      %c0_43 = arith.constant 0 : index
      %c0_44 = arith.constant 0 : index
      %82 = vector.load %arg17[%c0_43, %c0_44] : memref<8x64xf32, #tpu.memory_space<vmem>>, vector<8x16xf32>
      tpu.vector_store %arg17[%c0_43, %c0_44], %81 {strides = array<i32>} : memref<8x64xf32, #tpu.memory_space<vmem>>, vector<8x16xf32>,
      %83 = vector.extract_strided_slice %61 {offsets = [0, 16], sizes = [8, 16], strides = [1, 1]} : vector<8x64xf32> to vector<8x16xf32>
      %84 = vector.extract_strided_slice %62 {offsets = [0, 16], sizes = [8, 16], strides = [1, 1]} : vector<8x64xf32> to vector<8x16xf32>
      %85 = vector.extract_strided_slice %63 {offsets = [0, 16], sizes = [8, 16], strides = [1, 1]} : vector<8x64xf32> to vector<8x16xf32>
      %cst_45 = arith.constant dense<0.000000e+00> : vector<8x8xf32>
      %86 = tpu.matmul %83, %84, %cst_45 {dimension_numbers = #tpu.dot_dimension_numbers<[1], [1], [0], [0], [0, 0, 1, 0], [], []>, precision = #tpu.contract_precision<fp32>} : vector<8x16xf32>, vector<8x16xf32>, vector<8x8xf32> -> vector<8x8xf32>
      %87 = arith.addf %86, %65 : vector<8x8xf32>
      %cst_46 = arith.constant dense<0xFF800000> : vector<8xf32>
      %88 = vector.multi_reduction <maximumf>, %87, %cst_46 [1] : vector<8x8xf32> to vector<8xf32>
      %89 = vector.shape_cast %88 : vector<8xf32> to vector<8x1xf32>
      %90 = vector.broadcast %89 : vector<8x1xf32> to vector<8x8xf32>
      %91 = arith.subf %87, %90 : vector<8x8xf32>
      %92 = math.exp %91 : vector<8x8xf32>
      %cst_47 = arith.constant dense<0.000000e+00> : vector<8x16xf32>
      %93 = tpu.matmul %92, %85, %cst_47 {dimension_numbers = #tpu.dot_dimension_numbers<[1], [0], [0], [1], [0, 0, 1, 1], [], []>, precision = #tpu.contract_precision<fp32>} : vector<8x8xf32>, vector<8x16xf32>, vector<8x16xf32> -> vector<8x16xf32>
      %cst_48 = arith.constant dense<0.000000e+00> : vector<8xf32>
      %94 = vector.multi_reduction <add>, %92, %cst_48 [1] : vector<8x8xf32> to vector<8xf32>
      %95 = vector.shape_cast %94 : vector<8xf32> to vector<8x1xf32>
      %96 = tpu.reciprocal %95 {approx = true} : vector<8x1xf32> -> vector<8x1xf32>
      %97 = vector.broadcast %96 : vector<8x1xf32> to vector<8x16xf32>
      %98 = arith.mulf %93, %97 : vector<8x16xf32>
      %c0_49 = arith.constant 0 : index
      %c16 = arith.constant 16 : index
      %99 = vector.load %arg17[%c0_49, %c16] : memref<8x64xf32, #tpu.memory_space<vmem>>, vector<8x16xf32>
      tpu.vector_store %arg17[%c0_49, %c16], %98 {strides = array<i32>} : memref<8x64xf32, #tpu.memory_space<vmem>>, vector<8x16xf32>,
      %100 = vector.extract_strided_slice %61 {offsets = [0, 32], sizes = [8, 16], strides = [1, 1]} : vector<8x64xf32> to vector<8x16xf32>
      %101 = vector.extract_strided_slice %62 {offsets = [0, 32], sizes = [8, 16], strides = [1, 1]} : vector<8x64xf32> to vector<8x16xf32>
      %102 = vector.extract_strided_slice %63 {offsets = [0, 32], sizes = [8, 16], strides = [1, 1]} : vector<8x64xf32> to vector<8x16xf32>
      %cst_50 = arith.constant dense<0.000000e+00> : vector<8x8xf32>
      %103 = tpu.matmul %100, %101, %cst_50 {dimension_numbers = #tpu.dot_dimension_numbers<[1], [1], [0], [0], [0, 0, 1, 0], [], []>, precision = #tpu.contract_precision<fp32>} : vector<8x16xf32>, vector<8x16xf32>, vector<8x8xf32> -> vector<8x8xf32>
      %104 = arith.addf %103, %65 : vector<8x8xf32>
      %cst_51 = arith.constant dense<0xFF800000> : vector<8xf32>
      %105 = vector.multi_reduction <maximumf>, %104, %cst_51 [1] : vector<8x8xf32> to vector<8xf32>
      %106 = vector.shape_cast %105 : vector<8xf32> to vector<8x1xf32>
      %107 = vector.broadcast %106 : vector<8x1xf32> to vector<8x8xf32>
      %108 = arith.subf %104, %107 : vector<8x8xf32>
      %109 = math.exp %108 : vector<8x8xf32>
      %cst_52 = arith.constant dense<0.000000e+00> : vector<8x16xf32>
      %110 = tpu.matmul %109, %102, %cst_52 {dimension_numbers = #tpu.dot_dimension_numbers<[1], [0], [0], [1], [0, 0, 1, 1], [], []>, precision = #tpu.contract_precision<fp32>} : vector<8x8xf32>, vector<8x16xf32>, vector<8x16xf32> -> vector<8x16xf32>
      %cst_53 = arith.constant dense<0.000000e+00> : vector<8xf32>
      %111 = vector.multi_reduction <add>, %109, %cst_53 [1] : vector<8x8xf32> to vector<8xf32>
      %112 = vector.shape_cast %111 : vector<8xf32> to vector<8x1xf32>
      %113 = tpu.reciprocal %112 {approx = true} : vector<8x1xf32> -> vector<8x1xf32>
      %114 = vector.broadcast %113 : vector<8x1xf32> to vector<8x16xf32>
      %115 = arith.mulf %110, %114 : vector<8x16xf32>
      %c0_54 = arith.constant 0 : index
      %c32 = arith.constant 32 : index
      %116 = vector.load %arg17[%c0_54, %c32] : memref<8x64xf32, #tpu.memory_space<vmem>>, vector<8x16xf32>
      tpu.vector_store %arg17[%c0_54, %c32], %115 {strides = array<i32>} : memref<8x64xf32, #tpu.memory_space<vmem>>, vector<8x16xf32>,
      %117 = vector.extract_strided_slice %61 {offsets = [0, 48], sizes = [8, 16], strides = [1, 1]} : vector<8x64xf32> to vector<8x16xf32>
      %118 = vector.extract_strided_slice %62 {offsets = [0, 48], sizes = [8, 16], strides = [1, 1]} : vector<8x64xf32> to vector<8x16xf32>
      %119 = vector.extract_strided_slice %63 {offsets = [0, 48], sizes = [8, 16], strides = [1, 1]} : vector<8x64xf32> to vector<8x16xf32>
      %cst_55 = arith.constant dense<0.000000e+00> : vector<8x8xf32>
      %120 = tpu.matmul %117, %118, %cst_55 {dimension_numbers = #tpu.dot_dimension_numbers<[1], [1], [0], [0], [0, 0, 1, 0], [], []>, precision = #tpu.contract_precision<fp32>} : vector<8x16xf32>, vector<8x16xf32>, vector<8x8xf32> -> vector<8x8xf32>
      %121 = arith.addf %120, %65 : vector<8x8xf32>
      %cst_56 = arith.constant dense<0xFF800000> : vector<8xf32>
      %122 = vector.multi_reduction <maximumf>, %121, %cst_56 [1] : vector<8x8xf32> to vector<8xf32>
      %123 = vector.shape_cast %122 : vector<8xf32> to vector<8x1xf32>
      %124 = vector.broadcast %123 : vector<8x1xf32> to vector<8x8xf32>
      %125 = arith.subf %121, %124 : vector<8x8xf32>
      %126 = math.exp %125 : vector<8x8xf32>
      %cst_57 = arith.constant dense<0.000000e+00> : vector<8x16xf32>
      %127 = tpu.matmul %126, %119, %cst_57 {dimension_numbers = #tpu.dot_dimension_numbers<[1], [0], [0], [1], [0, 0, 1, 1], [], []>, precision = #tpu.contract_precision<fp32>} : vector<8x8xf32>, vector<8x16xf32>, vector<8x16xf32> -> vector<8x16xf32>
      %cst_58 = arith.constant dense<0.000000e+00> : vector<8xf32>
      %128 = vector.multi_reduction <add>, %126, %cst_58 [1] : vector<8x8xf32> to vector<8xf32>
      %129 = vector.shape_cast %128 : vector<8xf32> to vector<8x1xf32>
      %130 = tpu.reciprocal %129 {approx = true} : vector<8x1xf32> -> vector<8x1xf32>
      %131 = vector.broadcast %130 : vector<8x1xf32> to vector<8x16xf32>
      %132 = arith.mulf %127, %131 : vector<8x16xf32>
      %c0_59 = arith.constant 0 : index
      %c48 = arith.constant 48 : index
      %133 = vector.load %arg17[%c0_59, %c48] : memref<8x64xf32, #tpu.memory_space<vmem>>, vector<8x16xf32>
      tpu.vector_store %arg17[%c0_59, %c48], %132 {strides = array<i32>} : memref<8x64xf32, #tpu.memory_space<vmem>>, vector<8x16xf32>,
      %c0_60 = arith.constant 0 : index
      %c0_61 = arith.constant 0 : index
      %134 = vector.load %arg17[%c0_60, %c0_61] : memref<8x64xf32, #tpu.memory_space<vmem>>, vector<8x64xf32>
      %c0_62 = arith.constant 0 : index
      %c0_63 = arith.constant 0 : index
      %135 = vector.load %arg8[%c0_62, %c0_63] : memref<64x64xf32, #tpu.memory_space<vmem>>, vector<64x64xf32>
      %cst_64 = arith.constant dense<0.000000e+00> : vector<8x64xf32>
      %136 = tpu.matmul %134, %135, %cst_64 {dimension_numbers = #tpu.dot_dimension_numbers<[1], [0], [0], [1], [0, 0, 1, 1], [], []>, precision = #tpu.contract_precision<fp32>} : vector<8x64xf32>, vector<64x64xf32>, vector<8x64xf32> -> vector<8x64xf32>
      %c0_65 = arith.constant 0 : index
      %c0_66 = arith.constant 0 : index
      %137 = vector.load %arg9[%c0_65, %c0_66] : memref<1x64xf32, #tpu.memory_space<vmem>>, vector<1x64xf32>
      %138 = vector.broadcast %137 : vector<1x64xf32> to vector<8x64xf32>
      %139 = arith.addf %136, %138 : vector<8x64xf32>
      %140 = arith.addf %31, %139 : vector<8x64xf32>
      %c0_67 = arith.constant 0 : index
      %c0_68 = arith.constant 0 : index
      %141 = vector.load %arg19[%c0_67, %c0_68] : memref<8x64xf32, #tpu.memory_space<vmem>>, vector<8x64xf32>
      tpu.vector_store %arg19[%c0_67, %c0_68], %140 {strides = array<i32>} : memref<8x64xf32, #tpu.memory_space<vmem>>, vector<8x64xf32>,
      %c0_69 = arith.constant 0 : index
      %c0_70 = arith.constant 0 : index
      %142 = vector.load %arg10[%c0_69, %c0_70] : memref<1x64xf32, #tpu.memory_space<vmem>>, vector<1x64xf32>
      %c0_71 = arith.constant 0 : index
      %c0_72 = arith.constant 0 : index
      %143 = vector.load %arg11[%c0_71, %c0_72] : memref<1x64xf32, #tpu.memory_space<vmem>>, vector<1x64xf32>
      %cst_73 = arith.constant dense<0.000000e+00> : vector<8xf32>
      %144 = vector.multi_reduction <add>, %140, %cst_73 [1] : vector<8x64xf32> to vector<8xf32>
      %145 = vector.shape_cast %144 : vector<8xf32> to vector<8x1xf32>
      %cst_74 = arith.constant 6.400000e+01 : f32
      %146 = vector.broadcast %cst_74 : f32 to vector<8x1xf32>
      %147 = arith.divf %145, %146 : vector<8x1xf32>
      %148 = vector.broadcast %147 : vector<8x1xf32> to vector<8x64xf32>
      %149 = arith.subf %140, %148 : vector<8x64xf32>
      %150 = arith.mulf %149, %149 : vector<8x64xf32>
      %cst_75 = arith.constant dense<0.000000e+00> : vector<8xf32>
      %151 = vector.multi_reduction <add>, %150, %cst_75 [1] : vector<8x64xf32> to vector<8xf32>
      %152 = vector.shape_cast %151 : vector<8xf32> to vector<8x1xf32>
      %cst_76 = arith.constant 6.300000e+01 : f32
      %153 = vector.broadcast %cst_76 : f32 to vector<8x1xf32>
      %154 = arith.divf %152, %153 : vector<8x1xf32>
      %155 = math.sqrt %154 : vector<8x1xf32>
      %156 = vector.broadcast %142 : vector<1x64xf32> to vector<8x64xf32>
      %157 = arith.mulf %156, %149 : vector<8x64xf32>
      %cst_77 = arith.constant 9.99999997E-7 : f32
      %158 = vector.broadcast %cst_77 : f32 to vector<8x1xf32>
      %159 = arith.addf %155, %158 : vector<8x1xf32>
      %160 = vector.broadcast %159 : vector<8x1xf32> to vector<8x64xf32>
      %161 = arith.divf %157, %160 : vector<8x64xf32>
      %162 = vector.broadcast %143 : vector<1x64xf32> to vector<8x64xf32>
      %163 = arith.addf %161, %162 : vector<8x64xf32>
      %c0_78 = arith.constant 0 : index
      %c0_79 = arith.constant 0 : index
      %164 = vector.load %arg18[%c0_78, %c0_79] : memref<8x64xf32, #tpu.memory_space<vmem>>, vector<8x64xf32>
      tpu.vector_store %arg18[%c0_78, %c0_79], %163 {strides = array<i32>} : memref<8x64xf32, #tpu.memory_space<vmem>>, vector<8x64xf32>,
    } else {
    }
    %c0 = arith.constant 0 : index
    %c0_1 = arith.constant 0 : index
    %3 = vector.load %arg18[%c0, %c0_1] : memref<8x64xf32, #tpu.memory_space<vmem>>, vector<8x64xf32>
    %c0_2 = arith.constant 0 : index
    %c0_3 = arith.constant 0 : index
    %4 = vector.load %arg12[%c0_2, %c0_3] : memref<64x128xf32, #tpu.memory_space<vmem>>, vector<64x128xf32>
    %cst = arith.constant dense<0.000000e+00> : vector<8x128xf32>
    %5 = tpu.matmul %3, %4, %cst {dimension_numbers = #tpu.dot_dimension_numbers<[1], [0], [0], [1], [0, 0, 1, 1], [], []>, precision = #tpu.contract_precision<fp32>} : vector<8x64xf32>, vector<64x128xf32>, vector<8x128xf32> -> vector<8x128xf32>
    %c0_4 = arith.constant 0 : index
    %c0_5 = arith.constant 0 : index
    %6 = vector.load %arg13[%c0_4, %c0_5] : memref<1x128xf32, #tpu.memory_space<vmem>>, vector<1x128xf32>
    %7 = vector.broadcast %6 : vector<1x128xf32> to vector<8x128xf32>
    %8 = arith.addf %5, %7 : vector<8x128xf32>
    %cst_6 = arith.constant 5.000000e-01 : f32
    %9 = vector.broadcast %cst_6 : f32 to vector<8x128xf32>
    %10 = arith.mulf %9, %8 : vector<8x128xf32>
    %cst_7 = arith.constant 4.471500e-02 : f32
    %11 = vector.broadcast %cst_7 : f32 to vector<8x128xf32>
    %12 = arith.mulf %11, %8 : vector<8x128xf32>
    %13 = arith.mulf %12, %8 : vector<8x128xf32>
    %14 = arith.mulf %13, %8 : vector<8x128xf32>
    %15 = arith.addf %8, %14 : vector<8x128xf32>
    %cst_8 = arith.constant 0.797884583 : f32
    %16 = vector.broadcast %cst_8 : f32 to vector<8x128xf32>
    %17 = arith.mulf %16, %15 : vector<8x128xf32>
    %18 = math.tanh %17 : vector<8x128xf32>
    %cst_9 = arith.constant 1.000000e+00 : f32
    %19 = vector.broadcast %cst_9 : f32 to vector<8x128xf32>
    %20 = arith.addf %19, %18 : vector<8x128xf32>
    %21 = arith.mulf %10, %20 : vector<8x128xf32>
    %c0_10 = arith.constant 0 : index
    %c0_11 = arith.constant 0 : index
    %22 = vector.load %arg19[%c0_10, %c0_11] : memref<8x64xf32, #tpu.memory_space<vmem>>, vector<8x64xf32>
    %c0_12 = arith.constant 0 : index
    %c0_13 = arith.constant 0 : index
    %23 = vector.load %arg14[%c0_12, %c0_13] : memref<128x64xf32, #tpu.memory_space<vmem>>, vector<128x64xf32>
    %cst_14 = arith.constant dense<0.000000e+00> : vector<8x64xf32>
    %24 = tpu.matmul %21, %23, %cst_14 {dimension_numbers = #tpu.dot_dimension_numbers<[1], [0], [0], [1], [0, 0, 1, 1], [], []>, precision = #tpu.contract_precision<fp32>} : vector<8x128xf32>, vector<128x64xf32>, vector<8x64xf32> -> vector<8x64xf32>
    %25 = arith.addf %22, %24 : vector<8x64xf32>
    %c0_15 = arith.constant 0 : index
    %c0_16 = arith.constant 0 : index
    %26 = vector.load %arg19[%c0_15, %c0_16] : memref<8x64xf32, #tpu.memory_space<vmem>>, vector<8x64xf32>
    tpu.vector_store %arg19[%c0_15, %c0_16], %25 {strides = array<i32>} : memref<8x64xf32, #tpu.memory_space<vmem>>, vector<8x64xf32>,
    %c1_i32 = arith.constant 1 : i32
    %27 = arith.cmpi eq, %arg1, %c1_i32 : i32
    %28 = arith.extui %27 : i1 to i32
    %c0_i32_17 = arith.constant 0 : i32
    %29 = arith.cmpi ne, %28, %c0_i32_17 : i32
    scf.if %29 {
      %c0_18 = arith.constant 0 : index
      %c0_19 = arith.constant 0 : index
      %30 = vector.load %arg19[%c0_18, %c0_19] : memref<8x64xf32, #tpu.memory_space<vmem>>, vector<8x64xf32>
      %c0_20 = arith.constant 0 : index
      %c0_21 = arith.constant 0 : index
      %31 = vector.load %arg15[%c0_20, %c0_21] : memref<1x64xf32, #tpu.memory_space<vmem>>, vector<1x64xf32>
      %32 = vector.broadcast %31 : vector<1x64xf32> to vector<8x64xf32>
      %33 = arith.addf %30, %32 : vector<8x64xf32>
      %c0_22 = arith.constant 0 : index
      %c0_23 = arith.constant 0 : index
      %c0_24 = arith.constant 0 : index
      %34 = vector.load %arg16[%c0_22, %c0_23, %c0_24] : memref<1x8x64xf32, #tpu.memory_space<vmem>>, vector<1x8x64xf32>
      %35 = vector.shape_cast %34 : vector<1x8x64xf32> to vector<8x64xf32>
      %36 = vector.shape_cast %33 : vector<8x64xf32> to vector<1x8x64xf32>
      tpu.vector_store %arg16[%c0_22, %c0_23, %c0_24], %36 {strides = array<i32>} : memref<1x8x64xf32, #tpu.memory_space<vmem>>, vector<1x8x64xf32>,
    } else {
    }
    return
  }
  func.func @transform_0(%arg0: i32, %arg1: i32) -> (i32, i32, i32) {
    %c0_i32 = arith.constant 0 : i32
    %c0_i32_0 = arith.constant 0 : i32
    %c0_i32_1 = arith.constant 0 : i32
    return %arg0, %c0_i32, %c0_i32_0 : i32, i32, i32
  }
  func.func @transform_1(%arg0: i32, %arg1: i32) -> (i32, i32, i32) {
    %c0_i32 = arith.constant 0 : i32
    %c0_i32_0 = arith.constant 0 : i32
    %c0_i32_1 = arith.constant 0 : i32
    return %arg0, %c0_i32, %c0_i32_0 : i32, i32, i32
  }
  func.func @transform_2(%arg0: i32, %arg1: i32) -> (i32, i32) {
    %c0_i32 = arith.constant 0 : i32
    %c0_i32_0 = arith.constant 0 : i32
    %c0_i32_1 = arith.constant 0 : i32
    return %c0_i32, %c0_i32_0 : i32, i32
  }
  func.func @transform_3(%arg0: i32, %arg1: i32) -> (i32, i32) {
    %c0_i32 = arith.constant 0 : i32
    %c0_i32_0 = arith.constant 0 : i32
    %c0_i32_1 = arith.constant 0 : i32
    return %c0_i32, %c0_i32_0 : i32, i32
  }
  func.func @transform_4(%arg0: i32, %arg1: i32) -> (i32, i32) {
    %c0_i32 = arith.constant 0 : i32
    %c0_i32_0 = arith.constant 0 : i32
    %c0_i32_1 = arith.constant 0 : i32
    return %c0_i32, %c0_i32_0 : i32, i32
  }
  func.func @transform_5(%arg0: i32, %arg1: i32) -> (i32, i32) {
    %c0_i32 = arith.constant 0 : i32
    %c0_i32_0 = arith.constant 0 : i32
    %c0_i32_1 = arith.constant 0 : i32
    return %c0_i32, %c0_i32_0 : i32, i32
  }
  func.func @transform_6(%arg0: i32, %arg1: i32) -> (i32, i32) {
    %c0_i32 = arith.constant 0 : i32
    %c0_i32_0 = arith.constant 0 : i32
    %c0_i32_1 = arith.constant 0 : i32
    return %c0_i32, %c0_i32_0 : i32, i32
  }
  func.func @transform_7(%arg0: i32, %arg1: i32) -> (i32, i32) {
    %c0_i32 = arith.constant 0 : i32
    %c0_i32_0 = arith.constant 0 : i32
    %c0_i32_1 = arith.constant 0 : i32
    return %c0_i32, %c0_i32_0 : i32, i32
  }
  func.func @transform_8(%arg0: i32, %arg1: i32) -> (i32, i32) {
    %c0_i32 = arith.constant 0 : i32
    %c0_i32_0 = arith.constant 0 : i32
    %c0_i32_1 = arith.constant 0 : i32
    return %c0_i32, %c0_i32_0 : i32, i32
  }
  func.func @transform_9(%arg0: i32, %arg1: i32) -> (i32, i32) {
    %c0_i32 = arith.constant 0 : i32
    %c0_i32_0 = arith.constant 0 : i32
    %c0_i32_1 = arith.constant 0 : i32
    return %c0_i32, %c0_i32_0 : i32, i32
  }
  func.func @transform_10(%arg0: i32, %arg1: i32) -> (i32, i32) {
    %c0_i32 = arith.constant 0 : i32
    %c0_i32_0 = arith.constant 0 : i32
    return %c0_i32, %arg1 : i32, i32
  }
  func.func @transform_11(%arg0: i32, %arg1: i32) -> (i32, i32) {
    %c0_i32 = arith.constant 0 : i32
    %c0_i32_0 = arith.constant 0 : i32
    return %c0_i32, %arg1 : i32, i32
  }
  func.func @transform_12(%arg0: i32, %arg1: i32) -> (i32, i32) {
    %c0_i32 = arith.constant 0 : i32
    %c0_i32_0 = arith.constant 0 : i32
    return %arg1, %c0_i32 : i32, i32
  }
  func.func @transform_13(%arg0: i32, %arg1: i32) -> (i32, i32) {
    %c0_i32 = arith.constant 0 : i32
    %c0_i32_0 = arith.constant 0 : i32
    %c0_i32_1 = arith.constant 0 : i32
    return %c0_i32, %c0_i32_0 : i32, i32
  }
  func.func @transform_14(%arg0: i32, %arg1: i32) -> (i32, i32, i32) {
    %c0_i32 = arith.constant 0 : i32
    %c0_i32_0 = arith.constant 0 : i32
    %c0_i32_1 = arith.constant 0 : i32
    return %arg0, %c0_i32, %c0_i32_0 : i32, i32, i32
  }
}

</mosaic_0001>

<bundles_post_ra>
// kernel: tpu_custom_call.1
= control target key start
LH: loop header
LB: loop body
LE: loop exit
PB: predicated region body
PF: predicated region fallthrough
CT: control target
= control target key end

     0   :  { %s5014_s0 = inlined_call_operand.vmem [shape: f32[2,8,64], index: 0, kind: input, shape index: {}]   ;;  %s5015_s1 = inlined_call_operand.vmem [shape: f32[2,8,8], index: 1, kind: input, shape index: {}]   ;;  %s5016_s2 = inlined_call_operand.vmem [shape: f32[1,64], index: 2, kind: input, shape index: {}]   ;;  %s5017_s3 = inlined_call_operand.vmem [shape: f32[1,64], index: 3, kind: input, shape index: {}]   ;;  %s5018_s4 = inlined_call_operand.vmem [shape: f32[64,192], index: 4, kind: input, shape index: {}]   ;;  %s5019_s5 = inlined_call_operand.vmem [shape: f32[1,192], index: 5, kind: input, shape index: {}]   ;;  %s5020_s6 = inlined_call_operand.vmem [shape: f32[64,64], index: 6, kind: input, shape index: {}]   ;;  %s5021_s7 = inlined_call_operand.vmem [shape: f32[1,64], index: 7, kind: input, shape index: {}]   ;;  %s5022_s8 = inlined_call_operand.vmem [shape: f32[1,64], index: 8, kind: input, shape index: {}]   ;;  %s5023_s9 = inlined_call_operand.vmem [shape: f32[1,64], index: 9, kind: input, shape index: {}]   ;;  %s5024_s10 = inlined_call_operand.vmem [shape: f32[64,256], index: 10, kind: input, shape index: {}]   ;;  %s5025_s11 = inlined_call_operand.vmem [shape: f32[1,256], index: 11, kind: input, shape index: {}]   ;;  %s5026_s12 = inlined_call_operand.vmem [shape: f32[256,64], index: 12, kind: input, shape index: {}]   ;;  %s5027_s13 = inlined_call_operand.vmem [shape: f32[1,64], index: 13, kind: input, shape index: {}]   ;;  %s5028_s14 = inlined_call_operand.hbm [shape: f32[2,8,64], index: 14, kind: output, shape index: {}]  }
   0x1   :  { %5043 = sst [smem:[#allocation21_spill]] %s5021_s7 }
   0x2   :  { %5044 = sst [smem:[#allocation22_spill]] %s5022_s8 }
   0x3   :  { %5045 = sst [smem:[#allocation23_spill]] %s5023_s9 }
   0x4   :  { %5046 = sst [smem:[#allocation24_spill]] %s5024_s10 }
   0x5   :  { %5047 = sst [smem:[#allocation25_spill]] %s5027_s13 }
   0x6   :  { %5048 = sst [smem:[#allocation26_spill]] %s5028_s14 }
   0x7   :  { %19 = vsyncpa [#allocation7], 0 }
   0x8   :  { %21 = vsyncpa [#allocation7 + $0x1], 0  ;;  %s3891_s29 = smov 0   ;;  %s3893_s30 = smov 0  }
   0x9   :  { %s3895_s15 = smov 0   ;;  %s3897_s16 = smov 0  }
   0xa   :  { %s3899_s17 = smov 0   ;;  %s3901_s18 = smov 0  }
   0xb   :  { %s3903_s19 = smov 0   ;;  %s3905_s20 = smov 0  }
   0xc   :  { %s3907_s21 = smov 0   ;;  %s3909_s22 = smov 0  }
   0xd LB: > { %5049 = sst [smem:[#allocation9_spill]] %s3769_s29  ;;  %s3542_s23 = sadd.s32 4294967295, %s3805_s22   ;;  %s3805_s22 = sphi %s3909_s22, %s27_s22   ;;  %s3801_s21 = sphi %s3907_s21, %s5083_s21   ;;  %s3797_s20 = sphi %s3905_s20, %s5082_s20   ;;  %s3793_s19 = sphi %s3903_s19, %s5081_s19   ;;  %s3789_s18 = sphi %s3901_s18, %s5080_s18   ;;  %s3785_s17 = sphi %s3899_s17, %s5079_s17   ;;  %s3781_s16 = sphi %s3897_s16, %s5078_s16   ;;  %s3777_s15 = sphi %s3895_s15, %s5077_s15   ;;  %s3773_s30 = sphi %s3893_s30, %s5085_s30   ;;  %s3769_s29 = sphi %s3891_s29, %s5084_s29  }
   0xe   : > { %5050 = sst [smem:[#allocation10_spill]] %s3777_s15  ;;  %s3543_s24 = sadd.s32 4294967294, %s3805_s22  }
   0xf   : > { %5051 = sst [smem:[#allocation11_spill]] %s3785_s17  ;;  %s36_s25 = sadd.s32 1, %s3797_s20 }
  0x10   : > { %5052 = sst [smem:[#allocation12_spill]] %s3797_s20  ;;  %s39_s26 = sadd.s32 1, %s3801_s21 }
  0x11   : > { %5053 = sst [smem:[#allocation13_spill]] %s3801_s21  ;;  %p37_p0 = scmp.ge.s32.totalorder %s36_s25, 2 }
  0x12   : > { %5054 = sst [smem:[#allocation14_spill]] %s3805_s22  ;;  %s266_s27 = sadd.s32 1, %s3785_s17 }
  0x13   : > { %p273_p1 = scmp.ne.s32.totalorder %s3785_s17, %s3781_s16  ;;  %p274_p2 = scmp.eq.s32.totalorder %s3805_s22, 0 }
  0x14   : > { %s5087_s25 = smov (%p37_p0, %s36_s25), 0  ;;  %s5089_s26 = smov (!%p37_p0, %s39_s26), %s3801_s21 }
  0x15   : > { %5055 = sst [smem:[#allocation15_spill]] %s5087_s25  ;;  %s263_s28 = ssub.s32 %s3797_s20, %s5087_s25 }
  0x16   : > { %p3954_p3 = por %p274_p2, %p273_p1  ;;  %p41_p4 = scmp.ge.s32.totalorder %s5089_s26, 2 }
  0x17   : > { %p264_p5 = scmp.eq.s32.totalorder %s263_s28, 0  ;;  %s365_s13 = sadd.s32 1, %s3777_s15 }
  0x18   : > { %p375_p6 = scmp.ne.s32.totalorder %s3777_s15, %s3773_s30  ;;  %s5091_s26 = smov (%p41_p4, %s5089_s26), 0 }
  0x19   : > { %5057 = sst [smem:[#allocation16_spill]] %s5091_s26  ;;  %s362_s8 = ssub.s32 %s3801_s21, %s5091_s26 }
  0x1a   : > { %s3964_s9 = scalar_select %p264_p5, %s3785_s17, %s266_s27  }
  0x1b   : > { %p376_p7 = scmp.eq.s32.totalorder %s3542_s23, 3  ;;  %p363_p8 = scmp.eq.s32.totalorder %s362_s8, 0 }
  0x1c   : > { %5058 = sst [smem:[#allocation17_spill]] %s3964_s9  ;;  %p381_p9 = scmp.ne.s32.totalorder %s3773_s30, %s3769_s29 }
  0x1d   : > { %p3970_p10 = por %p376_p7, %p375_p6  ;;  %p382_p11 = scmp.eq.s32.totalorder %s3543_s24, 3 }
  0x1e   : > { %s3975_s25 = scalar_select %p363_p8, %s3777_s15, %s365_s13  }
  0x1f   : > { %s5059_s7 = scalar_select %p3970_p10, 1, 0 }
  0x20   : > { %5061 = sst [smem:[#allocation19_spill]] %s3975_s25  ;;  %p3977_p12 = por %p382_p11, %p381_p9 }
  0x21   : > { %5060 = sst [smem:[#allocation18_spill]] %s5059_s7  ;;  %p3545_p13 = scmp.ge.s32.totalorder %s3805_s22, 4 }
  0x22   : > { %s5062_s28 = scalar_select %p3977_p12, 1, 0 }
  0x23   : > { %425 = sbr.rel (%p3545_p13) target bundleno = 58 (0x3a), region = 52 }
  0x24   : > { %5063 = sst [smem:[#allocation20_spill]] %s5062_s28 }
  0x28   : > { %442 = sbr.rel (!%p3954_p3) target bundleno = 58 (0x3a), region = 64  ;;  %s444_s8 = sand.u32 (%p3954_p3), 1, %s3785_s17  }
  0x29   : > { %s3547_s23 = sshll.u32 (%p3954_p3), %s3797_s20, 3  ;;  %s3546_s27 = sshll.u32 (%p3954_p3), %s444_s8, 6 }
  0x2a   : > { %s5064_s10 = sld [smem:[#allocation24_spill]] (%p3954_p3)  ;;  %s446_s24 = scalar_lea.vmem (%p3954_p3), [#allocation5], %s3546_s27 }
  0x30   : > { %s448_s13 = scalar_lea.vmem %s5064_s10, %s3547_s23 }
  0x31   : > { %v491_v0 = vld [vmem:[%s448_s13] sm:$0xff]  ;;  %v493_v1 = vld [vmem:[%s448_s13 + $0x10] sm:$0xff] }
  0x32   : > { %v495_v2 = vld [vmem:[%s448_s13 + $0x20] sm:$0xff]  ;;  %492 = vst [vmem:[%s446_s24] sm:$0xff] %v491_v0  ;;  %v497_v3 = vld [vmem:[%s448_s13 + $0x30] sm:$0xff] }
  0x33   : > { %494 = vst [vmem:[%s446_s24 + $0x8] sm:$0xff] %v493_v1  ;;  %v499_v4 = vld [vmem:[%s448_s13 + $0x40] sm:$0xff]  ;;  %v501_v5 = vld [vmem:[%s448_s13 + $0x50] sm:$0xff] }
  0x34   : > { %496 = vst [vmem:[%s446_s24 + $0x10] sm:$0xff] %v495_v2  ;;  %v503_v6 = vld [vmem:[%s448_s13 + $0x60] sm:$0xff]  ;;  %v505_v7 = vld [vmem:[%s448_s13 + $0x70] sm:$0xff] }
  0x35   : > { %498 = vst [vmem:[%s446_s24 + $0x18] sm:$0xff] %v497_v3 }
  0x36   : > { %500 = vst [vmem:[%s446_s24 + $0x20] sm:$0xff] %v499_v4 }
  0x37   : > { %502 = vst [vmem:[%s446_s24 + $0x28] sm:$0xff] %v501_v5 }
  0x38   : > { %504 = vst [vmem:[%s446_s24 + $0x30] sm:$0xff] %v503_v6 }
  0x39   : > { %506 = vst [vmem:[%s446_s24 + $0x38] sm:$0xff] %v505_v7 }
  0x3a PF: > { %p3548_p0 = scmp.ge.s32.totalorder %s3805_s22, 1  ;;  %p526_p1 = scmp.lt.s32.totalorder %s3805_s22, 5 }
  0x3c   : > { %p527_p2 = pnand %p3548_p0, %p526_p1 }
  0x3d   : > { %s533_s14 = sand.u32 (!%p527_p2), 1, %s3781_s16   ;;  %s5034_s21 = sand.u32 (!%p527_p2), 1, %s3773_s30  }
  0x3e   : > { %530 = sbr.rel (%p527_p2) target bundleno = 2900 (0xb54), region = 110  ;;  %s3549_s26 = sshll.u32 (!%p527_p2), %s533_s14, 6 }
  0x3f   : > { %s3995_s8 = sshll.u32 (!%p527_p2), %s5034_s21, 3  ;;  %p594_p3 = scmp.lt.s32.totalorder (!%p527_p2), %s3793_s19, 1 }
  0x40   : > { %p602_p4 = scmp.lt.s32.totalorder (!%p527_p2), %s3789_s18, 1  ;;  %s3553_s23 = sshll.u32 (!%p527_p2), %s3789_s18, 4 }
  0x41   : > { %p606_p5 = scmp.lt.s32.totalorder (!%p527_p2), %s3553_s23, 31  ;;  %s4023_s7 = scalar_lea.vmem (!%p527_p2), [#allocation5], %s3549_s26 }
  0x42   : > { %s593_s10 = scalar_lea.vmem (!%p527_p2), [#allocation6], %s3995_s8  ;;  %p3555_p6 = scmp.ne.s32.totalorder (!%p527_p2), %s3789_s18, 0 }
  0x43   : > { %s595_s27 = scalar_select %p594_p3, %s3793_s19, 1 }
  0x44   : > { %s4002_s13 = scalar_select %p602_p4, %s3789_s18, 1 }
  0x45   : > { %s3551_s24 = sshll.u32 %s595_s27, 3  ;;  %s5093_s23 = smov (!%p606_p5, %s3553_s23), 31 }
  0x46   : > { %s4007_s9 = scalar_lea.vmem %s5014_s0, %s3551_s24  ;;  %s4012_s21 = scalar_lea.vmem %s5015_s1, %s3551_s24 }
  0x47   : > { %s604_s15 = scalar_lea.vmem %s5025_s11, %s4002_s13  ;;  %s3554_s28 = sshll.u32 %s5093_s23, 3 }
  0x48   : > { %s4021_s27 = scalar_lea.vmem %s5026_s12, %s3554_s28  ;;  %614 = sbr.rel (%p3555_p6) target bundleno = 2522 (0x9da), region = 118 }
  0x49   : > { %s3809_s28 = smov (!%p3555_p6), 48   ;;  %s3810_s26 = smov (!%p3555_p6), 64  }
  0x4a   : > { %s3811_s23 = smov (!%p3555_p6), 112   ;;  %s3812_s24 = smov (!%p3555_p6), 96  }
  0x4b   : > { %s3813_s16 = smov (!%p3555_p6), 16   ;;  %s3815_s14 = smov (!%p3555_p6), 80  }
  0x4c   : > { %s5067_s29 = sld [smem:[#allocation23_spill]] (!%p3555_p6) }
  0x4d   : > { %v615_v8 = vld [vmem:[%s4007_s9] sm:$0xff]  ;;  %vm618_vm0 = vcmask 523264   ;;  %v3807_v10 = vmov 64.0   ;;  %v3808_v22 = vmov 63.0   ;;  %v693_v23 = vld [vmem:[%s5018_s4 + $0x70] sm:$0xff]  ;;  %vm1183_vm9 = vcmask 130048  }
  0x4e   : > { %v619_v9 = vsel %vm618_vm0, %v615_v8, 0.0  ;;  %3662 = vrcp.f32 %v3807_v10  ;;  %v4042_v25 = vand.u32 4294901760, %v693_v23  ;;  %v691_v26 = vld [vmem:[%s5018_s4 + $0x60] sm:$0xff]  ;;  %v689_v30 = vld [vmem:[%s5018_s4 + $0x50] sm:$0xff]  ;;  %vm1335_vm10 = vcmask 64512  }
  0x4f   : > { %620 = vadd.xlane.f32.xlu0 %v619_v9  ;;  %3664 = vrcp.f32 %v3808_v22  ;;  %v4050_v28 = vand.u32 4294901760, %v691_v26  ;;  %v4063_v33 = vand.u32 4294901760, %v689_v30  ;;  %v687_v34 = vld [vmem:[%s5018_s4 + $0x40] sm:$0xff]  ;;  %v685_v40 = vld [vmem:[%s5018_s4 + $0x30] sm:$0xff]  ;;  %v694_v9 = vld [vmem:[%s5018_s4 + $0x78] sm:$0xff]  ;;  %vm1819_vm11 = vcmask 261248  }
  0x50   : > { %v4048_v27 = vsub.f32 %v693_v23, %v4042_v25  ;;  %845 = vmatpush.msra.mxu3 %v4042_v25  ;;  %713 = vmatpush.msra.mxu0 %v4042_v25  ;;  %v4078_v38 = vand.u32 4294901760, %v687_v34  ;;  %v4094_v45 = vand.u32 4294901760, %v685_v40  ;;  %v683_v46 = vld [vmem:[%s5018_s4 + $0x20] sm:$0xff]  ;;  %v681_v53 = vld [vmem:[%s5018_s4 + $0x10] sm:$0xff]  ;;  %v690_v22 = vld [vmem:[%s5018_s4 + $0x58] sm:$0xff]  ;;  %vm2142_vm12 = vcmask 392448  }
  0x51   : > { %v4060_v32 = vsub.f32 %v691_v26, %v4050_v28  ;;  %v4075_v37 = vsub.f32 %v689_v30, %v4063_v33  ;;  %v4105_v50 = vand.u32 4294901760, %v683_v46  ;;  %v4122_v57 = vand.u32 4294901760, %v681_v53  ;;  %v679_v59 = vld [vmem:[%s5018_s4] sm:$0xff] }
  0x52   : > { %v747_v31 = vand.u32 4294901760, %v4048_v27  ;;  %808 = vmatpush.msra.mxu2 %v4048_v27  ;;  %847 = vmatpush.msra.mxu3 %v4050_v28  ;;  %v4090_v44 = vsub.f32 %v687_v34, %v4078_v38  ;;  %v4109_v52 = vsub.f32 %v685_v40, %v4094_v45  ;;  %v4134_v63 = vand.u32 4294901760, %v679_v59 }
  0x53   : > { %715 = vmatpush.msra.mxu0 %v4050_v28  ;;  %v753_v36 = vand.u32 4294901760, %v4060_v32  ;;  %v759_v43 = vand.u32 4294901760, %v4075_v37  ;;  %v4120_v56 = vsub.f32 %v683_v46, %v4105_v50  ;;  %v4132_v62 = vsub.f32 %v681_v53, %v4122_v57 }
  0x54   : > { %v3663_v11 = vpop.eup %3662  ;;  %v748_v35 = vsub.f32 %v4048_v27, %v747_v31  ;;  %811 = vmatpush.msra.mxu2 %v4060_v32  ;;  %849 = vmatpush.msra.mxu3 %v4063_v33  ;;  %v765_v49 = vand.u32 4294901760, %v4090_v44  ;;  %v771_v58 = vand.u32 4294901760, %v4109_v52  ;;  %v4149_v4 = vsub.f32 %v679_v59, %v4134_v63  ;;  %v688_v27 = vld [vmem:[%s5018_s4 + $0x48] sm:$0xff] }
  0x55   : > { %v623_v12 = vmul.f32 64.0, %v3663_v11  ;;  %vm627_vm1 = vweird.f32 %v3663_v11  ;;  %v4040_v24 = vpop.eup %3664  ;;  %717 = vmatpush.msra.mxu0 %v4063_v33  ;;  %v754_v42 = vsub.f32 %v4060_v32, %v753_v36  ;;  %v760_v48 = vsub.f32 %v4075_v37, %v759_v43 }
  0x56   : > { %v636_v29 = vmul.f32 63.0, %v4040_v24  ;;  %v749_v41 = vand.u32 4294901760, %v748_v35  ;;  %814 = vmatpush.msra.mxu2 %v4075_v37  ;;  %851 = vmatpush.msra.mxu3 %v4078_v38  ;;  %v766_v55 = vsub.f32 %v4090_v44, %v765_v49  ;;  %v777_v61 = vand.u32 4294901760, %v4120_v56  ;;  %v684_v35 = vld [vmem:[%s5018_s4 + $0x28] sm:$0xff] }
  0x57   : > { %v624_v13 = vsub.f32 1.0, %v623_v12  ;;  %719 = vmatpush.msra.mxu0 %v4078_v38  ;;  %v755_v47 = vand.u32 4294901760, %v754_v42  ;;  %v761_v54 = vand.u32 4294901760, %v760_v48  ;;  %v772_v1 = vsub.f32 %v4109_v52, %v771_v58  ;;  %v682_v48 = vld [vmem:[%s5018_s4 + $0x18] sm:$0xff] }
  0x58   : > { %v637_v39 = vsub.f32 1.0, %v636_v29  ;;  %750 = vmatpush.msra.mxu1 %v749_v41  ;;  %817 = vmatpush.msra.mxu2 %v4090_v44  ;;  %v767_v60 = vand.u32 4294901760, %v766_v55  ;;  %vm640_vm2 = vweird.f32 %v4040_v24  ;;  %v778_v2 = vsub.f32 %v4120_v56, %v777_v61  ;;  %v686_v29 = vld [vmem:[%s5018_s4 + $0x38] sm:$0xff]  ;;  %v680_v55 = vld [vmem:[%s5018_s4 + $0x8] sm:$0xff] }
  0x59   : > { %v625_v14 = vmul.f32 %v3663_v11, %v624_v13  ;;  %853 = vmatpush.msra.mxu3 %v4094_v45  ;;  %721 = vmatpush.msra.mxu0 %v4094_v45  ;;  %v783_v3 = vand.u32 4294901760, %v4132_v62  ;;  %v773_v5 = vand.u32 4294901760, %v772_v1  ;;  %v4211_v32 = vand.u32 4294901760, %v688_v27 }
  0x5a   : > { %v638_v51 = vmul.f32 %v4040_v24, %v637_v39  ;;  %756 = vmatpush.msra.mxu1 %v755_v47  ;;  %820 = vmatpush.msra.mxu2 %v4109_v52  ;;  %v779_v6 = vand.u32 4294901760, %v778_v2  ;;  %vm2465_vm13 = vcmask 523648  }
  0x5b   : > { %v626_v15 = vadd.f32 %v3663_v11, %v625_v14  ;;  %855 = vmatpush.msra.mxu3 %v4105_v50  ;;  %723 = vmatpush.msra.mxu0 %v4105_v50  ;;  %v784_v7 = vsub.f32 %v4132_v62, %v783_v3  ;;  %v692_v14 = vld [vmem:[%s5018_s4 + $0x68] sm:$0xff]  ;;  %v4230_v41 = vsub.f32 %v688_v27, %v4211_v32  ;;  %v3657_v27 = vld [vmem:[%s5016_s2] ss:$0 sm:$0xff] }
  0x5c   : > { %762 = vmatpush.msra.mxu1 %v761_v54  ;;  %v639_v0 = vadd.f32 %v4040_v24, %v638_v51  ;;  %823 = vmatpush.msra.mxu2 %v4120_v56 }
  0x5d   : > { %v4029_v16 = vsel %vm627_vm1, %v3663_v11, %v626_v15  ;;  %857 = vmatpush.msra.mxu3 %v4122_v57  ;;  %725 = vmatpush.msra.mxu0 %v4122_v57  ;;  %v4166_v11 = vand.u32 4294901760, %v694_v9  ;;  %v785_v12 = vand.u32 4294901760, %v784_v7  ;;  %v1002_v46 = vand.u32 4294901760, %v4230_v41 }
  0x5e   : > { %768 = vmatpush.msra.mxu1 %v767_v60  ;;  %826 = vmatpush.msra.mxu2 %v4132_v62  ;;  %v4163_v10 = vsel %vm640_vm2, %v4040_v24, %v639_v0  ;;  %v4192_v24 = vand.u32 4294901760, %v690_v22 }
  0x5f   : > { %859 = vmatpush.msra.mxu3 %v4134_v63  ;;  %727 = vmatpush.msra.mxu0 %v4134_v63  ;;  %v1003_v52 = vsub.f32 %v4230_v41, %v1002_v46 }
  0x60   : > { %774 = vmatpush.msra.mxu1 %v773_v5  ;;  %829 = vmatpush.msra.mxu2 %v4149_v4  ;;  %v4214_v34 = vsub.f32 %v690_v22, %v4192_v24 }
  0x61   : > { %878 = vmatpush.msrb.mxu0 %v747_v31 }
  0x62   : > { %780 = vmatpush.msra.mxu1 %v779_v6  ;;  %950 = vmatpush.msrb.mxu2 %v4166_v11  ;;  %v996_v40 = vand.u32 4294901760, %v4214_v34 }
  0x63   : > { %882 = vmatpush.msrb.mxu0 %v753_v36  ;;  %v4220_v36 = vand.u32 4294901760, %v686_v29 }
  0x64   : > { %786 = vmatpush.msra.mxu1 %v785_v12  ;;  %v997_v44 = vsub.f32 %v4214_v34, %v996_v40 }
  0x65   : > { %886 = vmatpush.msrb.mxu0 %v759_v43  ;;  %v4236_v42 = vsub.f32 %v686_v29, %v4220_v36 }
  0x66   : > { %v998_v51 = vand.u32 4294901760, %v997_v44 }
  0x67   : > { %890 = vmatpush.msrb.mxu0 %v765_v49 }
  0x69   : > { %894 = vmatpush.msrb.mxu0 %v771_v58  ;;  %v1004_v58 = vand.u32 4294901760, %v1003_v52 }
  0x6b   : > { %898 = vmatpush.msrb.mxu0 %v777_v61 }
  0x6d   : > { %902 = vmatpush.msrb.mxu0 %v783_v3 }
  0xc2   : > { %v621_v17 = vpop.xlane.xlu0 %620 }
  0xc3   : > { %v629_v18 = vmul.f32 %v4029_v16, %v621_v17  ;;  %v4177_v17 = vand.u32 4294901760, %v692_v14 }
  0xc5   : > { %v4032_v19 = vsub.f32 %v615_v8, %v629_v18  ;;  %v789_v8 = vand.u32 4294901760, %v4149_v4  ;;  %v4180_v18 = vsub.f32 %v694_v9, %v4166_v11  ;;  %952 = vmatpush.msrb.mxu2 %v4177_v17  ;;  %v4195_v26 = vsub.f32 %v692_v14, %v4177_v17 }
  0xc7   : > { %v631_v20 = vmul.f32 %v4032_v19, %v4032_v19  ;;  %v790_v13 = vsub.f32 %v4149_v4, %v789_v8  ;;  %v984_v23 = vand.u32 4294901760, %v4180_v18  ;;  %954 = vmatpush.msrb.mxu2 %v4192_v24  ;;  %v990_v31 = vand.u32 4294901760, %v4195_v26  ;;  %906 = vmatpush.msrb.mxu0 %v789_v8 }
  0xc9   : > { %v632_v21 = vsel %vm618_vm0, %v631_v20, 0.0  ;;  %v985_v30 = vsub.f32 %v4180_v18, %v984_v23  ;;  %v991_v39 = vsub.f32 %v4195_v26, %v990_v31  ;;  %956 = vmatpush.msrb.mxu2 %v4211_v32 }
  0xca   : > { %633 = vadd.xlane.f32.xlu0 %v632_v21  ;;  %v791_v21 = vand.u32 4294901760, %v790_v13 }
  0xcb   : > { %v986_v37 = vand.u32 4294901760, %v985_v30  ;;  %v992_v43 = vand.u32 4294901760, %v991_v39  ;;  %958 = vmatpush.msrb.mxu2 %v4220_v36 }
  0xcc   : > { %792 = vmatpush.msra.mxu1 %v791_v21 }
  0xcd   : > { %987 = vmatpush.msrb.mxu3 %v986_v37 }
  0xce   : > { %921 = vmatpush.msrb.mxu1 %v4042_v25  ;;  %v4233_v25 = vand.u32 4294901760, %v684_v35 }
  0xcf   : > { %993 = vmatpush.msrb.mxu3 %v992_v43  ;;  %v3658_v43 = vld [vmem:[%s5017_s3] ss:$0 sm:$0xff] }
  0xd0   : > { %923 = vmatpush.msrb.mxu1 %v4050_v28  ;;  %v1008_v28 = vand.u32 4294901760, %v4236_v42  ;;  %960 = vmatpush.msrb.mxu2 %v4233_v25  ;;  %v4264_v54 = vsub.f32 %v684_v35, %v4233_v25 }
  0xd1   : > { %999 = vmatpush.msrb.mxu3 %v998_v51 }
  0xd2   : > { %925 = vmatpush.msrb.mxu1 %v4063_v33  ;;  %v4257_v33 = vand.u32 4294901760, %v682_v48  ;;  %v1009_v53 = vsub.f32 %v4236_v42, %v1008_v28  ;;  %v1014_v61 = vand.u32 4294901760, %v4264_v54 }
  0xd3   : > { %1005 = vmatpush.msrb.mxu3 %v1004_v58 }
  0xd4   : > { %927 = vmatpush.msrb.mxu1 %v4078_v38  ;;  %962 = vmatpush.msrb.mxu2 %v4257_v33  ;;  %v4272_v38 = vand.u32 4294901760, %v680_v55  ;;  %v4275_v59 = vsub.f32 %v682_v48, %v4257_v33  ;;  %v1010_v60 = vand.u32 4294901760, %v1009_v53 }
  0xd6   : > { %929 = vmatpush.msrb.mxu1 %v4094_v45  ;;  %964 = vmatpush.msrb.mxu2 %v4272_v38  ;;  %v1020_v0 = vand.u32 4294901760, %v4275_v59  ;;  %v4284_v1 = vsub.f32 %v680_v55, %v4272_v38  ;;  %v1015_v45 = vsub.f32 %v4264_v54, %v1014_v61 }
  0xd7   : > { %1011 = vmatpush.msrb.mxu3 %v1010_v60 }
  0xd8   : > { %931 = vmatpush.msrb.mxu1 %v4105_v50  ;;  %v1021_v3 = vsub.f32 %v4275_v59, %v1020_v0  ;;  %v1026_v4 = vand.u32 4294901760, %v4284_v1  ;;  %v1016_v5 = vand.u32 4294901760, %v1015_v45 }
  0xda   : > { %933 = vmatpush.msrb.mxu1 %v4122_v57  ;;  %v1022_v7 = vand.u32 4294901760, %v1021_v3  ;;  %v1027_v50 = vsub.f32 %v4284_v1, %v1026_v4  ;;  %1017 = vmatpush.msrb.mxu3 %v1016_v5 }
  0xdc   : > { %935 = vmatpush.msrb.mxu1 %v4134_v63  ;;  %v1028_v9 = vand.u32 4294901760, %v1027_v50  ;;  %1023 = vmatpush.msrb.mxu3 %v1022_v7 }
  0xde   : > { %1029 = vmatpush.msrb.mxu3 %v1028_v9 }
 0x13d   : > { %v634_v15 = vpop.xlane.xlu0 %633 }
 0x13e   : > { %v4183_v20 = vmul.f32 %v4163_v10, %v634_v15 }
 0x140   : > { %3666 = vrsqrt.f32 %v4183_v20  ;;  %vm650_vm3 = vcmp.eq.f32.partialorder %v4183_v20, inf  ;;  %v653_v12 = vand.u32 2147483648, %v4183_v20  ;;  %vm652_vm4 = vcmp.eq.f32.partialorder %v4183_v20, 0.0 }
 0x146   : > { %v3667_v47 = vpop.eup %3666 }
 0x147   : > { %v644_v49 = vmul.f32 %v3667_v47, %v4183_v20 }
 0x149   : > { %v645_v56 = vmul.f32 %v3667_v47, %v644_v49 }
 0x14b   : > { %v646_v62 = vmul.f32 0.5, %v645_v56 }
 0x14d   : > { %v647_v2 = vsub.f32 1.5, %v646_v62 }
 0x14f   : > { %v648_v6 = vmul.f32 %v3667_v47, %v647_v2 }
 0x151   : > { %v649_v8 = vmul.f32 %v648_v6, %v4183_v20 }
 0x153   : > { %v651_v57 = vsel %vm650_vm3, %v4183_v20, %v649_v8  ;;  %v658_v20 = vmul.f32 %v3657_v27, %v4032_v19 }
 0x154   : > { %v654_v13 = vsel %vm652_vm4, %v653_v12, %v651_v57 }
 0x155   : > { %v659_v14 = vadd.f32 1e-06, %v654_v13 }
 0x157   : > { %3668 = vrcp.f32 %v659_v14  ;;  %v671_v22 = vand.u32 2147483648, %v659_v14  ;;  %v669_v30 = vand.u32 2147483647, %v659_v14  ;;  %vm665_vm6 = vweird.f32 %v659_v14 }
 0x159   : > { %v672_v37 = vor.u32 1.1754944e-38, %v671_v22  ;;  %vm670_vm8 = vcmp.eq.f32.partialorder %v669_v30, 8.507059e+37 }
 0x15d   : > { %v3669_v15 = vpop.eup %3668 }
 0x15e   : > { %v661_v21 = vmul.f32 %v3669_v15, %v659_v14  ;;  %vm666_vm5 = vweird.f32 %v3669_v15 }
 0x15f   : > { %vm667_vm7 = vmor %vm665_vm6, %vm666_vm5 }
 0x160   : > { %v662_v63 = vsub.f32 1.0, %v661_v21 }
 0x162   : > { %v663_v29 = vmul.f32 %v3669_v15, %v662_v63 }
 0x164   : > { %v664_v35 = vadd.f32 %v3669_v15, %v663_v29 }
 0x166   : > { %v668_v39 = vsel %vm667_vm7, %v3669_v15, %v664_v35 }
 0x167   : > { %v673_v44 = vsel %vm670_vm8, %v672_v37, %v668_v39 }
 0x168   : > { %v674_v47 = vmul.f32 %v673_v44, %v658_v20 }
 0x16a   : > { %v678_v48 = vadd.f32 %v3658_v43, %v674_v47  ;;  %v4386_v47 = vld [vmem:[%s4012_s21] sm:$0xff]  ;;  %s3814_s21 = smov 32  }
 0x16c   : > { %v702_v49 = vsel %vm618_vm0, %v678_v48, 0 }
 0x16d   : > { %v728_v51 = vand.u32 4294901760, %v702_v49 }
 0x16f   : > { %794 = vmatmul.f32.vlgmr.msra.gmra.mxu1 %v728_v51  ;;  %v729_v52 = vsub.f32 %v702_v49, %v728_v51 }
 0x170   : > { %1082 = vmatpush.msra.mxu1 %v4166_v11 }
 0x171   : > { %832 = vmatmul.f32.vlgmr.msra.gmra.mxu2 %v729_v52  ;;  %v730_v53 = vand.u32 4294901760, %v729_v52 }
 0x172   : > { %1084 = vmatpush.msra.mxu1 %v4177_v17  ;;  %1115 = vmatpush.msra.mxu2 %v984_v23 }
 0x173   : > { %863 = vmatmul.f32.vlgmr.msra.gmra.mxu3 %v730_v53  ;;  %v731_v19 = vsub.f32 %v729_v52, %v730_v53 }
 0x174   : > { %1086 = vmatpush.msra.mxu1 %v4192_v24  ;;  %1119 = vmatpush.msra.mxu2 %v990_v31 }
 0x175   : > { %1158 = vmatpush.msra.mxu3 %v4166_v11  ;;  %v732_v55 = vand.u32 4294901760, %v731_v19  ;;  %v695_v11 = vld [vmem:[%s5019_s5] sm:$0x3] }
 0x176   : > { %1088 = vmatpush.msra.mxu1 %v4211_v32  ;;  %1123 = vmatpush.msra.mxu2 %v996_v40 }
 0x177   : > { %1160 = vmatpush.msra.mxu3 %v4177_v17  ;;  %733 = vmatmul.f32.vlgmr.msra.gmra.mxu0 %v732_v55  ;;  %v697_v17 = vperm.slane %v695_v11, 0 }
 0x178   : > { %937 = vmatmul.f32.vlgmr.msrb.gmra.mxu1 %v728_v51  ;;  %1045 = vmatpush.msra.mxu0 %v4180_v18 }
 0x179   : > { %1090 = vmatpush.msra.mxu1 %v4220_v36  ;;  %1127 = vmatpush.msra.mxu2 %v1002_v46 }
 0x17a   : > { %1162 = vmatpush.msra.mxu3 %v4192_v24  ;;  %970 = vmatmul.f32.vlgmr.msrb.gmra.mxu2 %v732_v55 }
 0x17b   : > { %1048 = vmatpush.msra.mxu0 %v4195_v26  ;;  %1092 = vmatpush.msra.mxu1 %v4233_v25 }
 0x17c   : > { %1131 = vmatpush.msra.mxu2 %v1008_v28  ;;  %1164 = vmatpush.msra.mxu3 %v4211_v32 }
 0x17d   : > { %1031 = vmatmul.f32.vlgmr.msrb.gmra.mxu3 %v728_v51  ;;  %1051 = vmatpush.msra.mxu0 %v4214_v34 }
 0x17e   : > { %1094 = vmatpush.msra.mxu1 %v4257_v33  ;;  %1135 = vmatpush.msra.mxu2 %v1014_v61 }
 0x17f   : > { %1166 = vmatpush.msra.mxu3 %v4220_v36  ;;  %1054 = vmatpush.msra.mxu0 %v4230_v41  ;;  %v698_v41 = vperm.slane %v695_v11, 1 }
 0x180   : > { %1096 = vmatpush.msra.mxu1 %v4272_v38  ;;  %1139 = vmatpush.msra.mxu2 %v1020_v0 }
 0x181   : > { %1168 = vmatpush.msra.mxu3 %v4233_v25  ;;  %908 = vmatmul.f32.vlgmr.msrb.gmra.mxu0 %v728_v51 }
 0x182   : > { %1100 = vmatmul.f32.vlgmr.msra.gmra.mxu1 %v730_v53  ;;  %1057 = vmatpush.msra.mxu0 %v4236_v42 }
 0x183   : > { %1143 = vmatpush.msra.mxu2 %v1026_v4  ;;  %1170 = vmatpush.msra.mxu3 %v4257_v33 }
 0x184   : > { %1145 = vmatmul.f32.vlgmr.msra.gmra.mxu2 %v728_v51  ;;  %1060 = vmatpush.msra.mxu0 %v4264_v54 }
 0x185   : > { %1172 = vmatpush.msra.mxu3 %v4272_v38 }
 0x186   : > { %1174 = vmatmul.f32.vlgmr.msra.gmra.mxu3 %v728_v51  ;;  %1063 = vmatpush.msra.mxu0 %v4275_v59 }
 0x188   : > { %1066 = vmatpush.msra.mxu0 %v4284_v1 }
 0x189   : > { %1069 = vmatmul.f32.vlgmr.msra.gmra.mxu0 %v729_v52 }
 0x1ec   : > { %v795_v18 = vpop.f32.mrf.mxu1 }
 0x1f4   : > { %v734_v23 = vpop.f32.mrf.mxu0  ;;  %v833_v24 = vpop.f32.mrf.mxu2 }
 0x1f5   : > { %v735_v26 = vadd.f32 %v734_v23, %v697_v17  ;;  %v938_v40 = vpop.f32.mrf.mxu1 }
 0x1f6   : > { %v864_v32 = vpop.f32.mrf.mxu3 }
 0x1f7   : > { %v796_v31 = vadd.f32 %v795_v18, %v735_v26 }
 0x1f9   : > { %v834_v34 = vadd.f32 %v833_v24, %v796_v31 }
 0x1fb   : > { %v865_v36 = vadd.f32 %v864_v32, %v834_v34 }
 0x1fd   : > { %v971_v42 = vpop.f32.mrf.mxu2 }
 0x1fe   : > { %v909_v25 = vpop.f32.mrf.mxu0  ;;  %v972_v33 = vadd.f32 %v971_v42, %v698_v41 }
 0x1ff   : > { %v910_v46 = vadd.f32 %v909_v25, %v865_v36  ;;  %v1101_v59 = vpop.f32.mrf.mxu1 }
 0x200   : > { %v1032_v54 = vpop.f32.mrf.mxu3 }
 0x201   : > { %v4355_v28 = vadd.f32 %v938_v40, %v910_v46  ;;  %v1033_v56 = vadd.f32 %v1032_v54, %v972_v33 }
 0x203   : > { %1499 = vrot.lane.b32.xlu2 %v4355_v28, %s3809_s28  ;;  %1181 = vrot.lane.b32.xlu1 %v4355_v28, %s3810_s26  ;;  %v4361_v61 = vmul.f32 0.25, %v4355_v28 }
 0x205   : > { %v1185_v3 = vsel %vm1183_vm9, %v4361_v61, 0 }
 0x206   : > { %v1070_v58 = vpop.f32.mrf.mxu0  ;;  %v1206_v5 = vand.u32 4294901760, %v1185_v3 }
 0x207   : > { %v1071_v38 = vadd.f32 %v1070_v58, %v1033_v56  ;;  %v1146_v62 = vpop.f32.mrf.mxu2 }
 0x208   : > { %v1207_v7 = vsub.f32 %v1185_v3, %v1206_v5 }
 0x209   : > { %v1102_v60 = vadd.f32 %v1101_v59, %v1071_v38  ;;  %v1175_v1 = vpop.f32.mrf.mxu3 }
 0x20a   : > { %v1208_v8 = vand.u32 4294901760, %v1207_v7 }
 0x20b   : > { %1497 = vrot.lane.b32.xlu2 %v4361_v61, %s3811_s23  ;;  %v1147_v0 = vadd.f32 %v1146_v62, %v1102_v60 }
 0x20c   : > { %v1209_v14 = vsub.f32 %v1207_v7, %v1208_v8 }
 0x20d   : > { %v4364_v45 = vadd.f32 %v1175_v1, %v1147_v0 }
 0x20e   : > { %v1210_v27 = vand.u32 4294901760, %v1209_v14 }
 0x20f   : > { %v1360_v9 = vand.u32 4294901760, %v4364_v45 }
 0x211   : > { %v1387_v21 = vsub.f32 %v4364_v45, %v1360_v9 }
 0x213   : > { %1658 = vrot.lane.b32.xlu2 %v4364_v45, %s3811_s23  ;;  %v1388_v30 = vand.u32 4294901760, %v1387_v21  ;;  %s5065_s23 = sld [smem:[#allocation21_spill]] }
 0x215   : > { %v1389_v39 = vsub.f32 %v1387_v21, %v1388_v30 }
 0x217   : > { %v1390_v43 = vand.u32 4294901760, %v1389_v39 }
 0x21b   : > { %1821 = vrot.lane.b32.xlu2 %v4361_v61, %s3812_s24 }
 0x25d   : > { %v1500_v2 = vpop.permute.xlu2 %1499 }
 0x25e   : > { %v1503_v4 = vsel %vm1183_vm9, %v1500_v2, 0 }
 0x25f   : > { %v4372_v6 = vand.u32 4294901760, %v1503_v4 }
 0x261   : > { %v4375_v50 = vsub.f32 %v1503_v4, %v4372_v6 }
 0x263   : > { %v1548_v12 = vand.u32 4294901760, %v4375_v50 }
 0x265   : > { %v1549_v63 = vsub.f32 %v4375_v50, %v1548_v12  ;;  %v1498_v26 = vpop.permute.xlu2 %1497 }
 0x266   : > { %v1501_v40 = vsel %vm1183_vm9, %v1498_v26, 0 }
 0x267   : > { %v1550_v35 = vand.u32 4294901760, %v1549_v63  ;;  %v1522_v25 = vand.u32 4294901760, %v1501_v40 }
 0x269   : > { %v1523_v33 = vsub.f32 %v1501_v40, %v1522_v25 }
 0x26b   : > { %v1524_v38 = vand.u32 4294901760, %v1523_v33 }
 0x26d   : > { %v1659_v34 = vpop.permute.xlu2 %1658  ;;  %v1525_v0 = vsub.f32 %v1523_v33, %v1524_v38 }
 0x26e   : > { %v1679_v41 = vand.u32 4294901760, %v1659_v34 }
 0x26f   : > { %v1526_v4 = vand.u32 4294901760, %v1525_v0 }
 0x270   : > { %v1706_v42 = vsub.f32 %v1659_v34, %v1679_v41 }
 0x272   : > { %v1707_v58 = vand.u32 4294901760, %v1706_v42 }
 0x274   : > { %v1708_v62 = vsub.f32 %v1706_v42, %v1707_v58 }
 0x275   : > { %v1182_v57 = vpop.permute.xlu1 %1181 }
 0x276   : > { %v1187_v13 = vsel %vm1183_vm9, %v1182_v57, 0  ;;  %v1709_v3 = vand.u32 4294901760, %v1708_v62 }
 0x277   : > { %v1204_v15 = vand.u32 4294901760, %v1187_v13 }
 0x279   : > { %v1231_v22 = vsub.f32 %v1187_v13, %v1204_v15  ;;  %1205 = vmatpush.xpose.msrb.mxu2 %v1204_v15  ;;  %1329 = vmatpush.xpose.msrb.mxu1 %v1204_v15 }
 0x27b   : > { %v1232_v29 = vand.u32 4294901760, %v1231_v22 }
 0x27c   : > { %1211 = vmatmul.f32.vlgmr.msrb.gmra.mxu2 %v1210_v27  ;;  %1331 = vmatmul.f32.vlgmr.msrb.gmra.mxu1 %v1206_v5 }
 0x27d   : > { %1437 = vmatpush.msra.mxu1 %v1360_v9  ;;  %1258 = vmatpush.xpose.msra.mxu2 %v1231_v22  ;;  %v1233_v37 = vsub.f32 %v1231_v22, %v1232_v29 }
 0x27e   : > { %1307 = vmatpush.xpose.msrb.mxu0 %v1232_v29 }
 0x27f   : > { %1551 = vmatpush.xpose.msrb.mxu1 %v1550_v35  ;;  %v1234_v20 = vand.u32 4294901760, %v1233_v37 }
 0x281   : > { %1361 = vmatpush.msrb.mxu2 %v1360_v9  ;;  %1309 = vmatmul.f32.vlgmr.msrb.gmra.mxu0 %v1206_v5 }
 0x282   : > { %1414 = vmatpush.msra.mxu0 %v1387_v21  ;;  %1235 = vmatpush.xpose.msrb.mxu3 %v1234_v20 }
 0x284   : > { %1521 = vmatpush.xpose.msrb.mxu0 %v4372_v6  ;;  %1261 = vmatmul.f32.vlgmr.msra.gmra.mxu2 %v1207_v7 }
 0x285   : > { %1237 = vmatmul.f32.vlgmr.msrb.gmra.mxu3 %v1206_v5  ;;  %1463 = vmatpush.msra.mxu2 %v1388_v30 }
 0x286   : > { %1281 = vmatpush.xpose.msra.mxu3 %v1204_v15 }
 0x28a   : > { %1391 = vmatpush.msrb.mxu3 %v1390_v43 }
 0x28d   : > { %1285 = vmatmul.f32.vlgmr.msra.gmra.mxu3 %v1208_v8 }
 0x28e   : > { %1485 = vmatpush.msra.mxu3 %v1360_v9 }
 0x2f9   : > { %v1332_v18 = vpop.f32.mrf.mxu1 }
 0x2fe   : > { %v1310_v11 = vpop.f32.mrf.mxu0 }
 0x2ff   : > { %v1212_v44 = vpop.f32.mrf.mxu2 }
 0x300   : > { %v1213_v49 = vadd.f32 %v1212_v44, %v4386_v47 }
 0x307   : > { %v1262_v52 = vpop.f32.mrf.mxu2 }
 0x308   : > { %v1238_v48 = vpop.f32.mrf.mxu3 }
 0x309   : > { %v1239_v51 = vadd.f32 %v1238_v48, %v1213_v49 }
 0x30b   : > { %v1263_v53 = vadd.f32 %v1262_v52, %v1239_v51  ;;  %v1822_v52 = vpop.permute.xlu2 %1821 }
 0x310   : > { %v1286_v19 = vpop.f32.mrf.mxu3 }
 0x311   : > { %v1287_v55 = vadd.f32 %v1286_v19, %v1263_v53  ;;  %v1825_v19 = vsel %vm1183_vm9, %v1822_v52, 0 }
 0x313   : > { %v1311_v17 = vadd.f32 %v1310_v11, %v1287_v55  ;;  %v1846_v55 = vand.u32 4294901760, %v1825_v19 }
 0x315   : > { %v1333_v23 = vadd.f32 %v1332_v18, %v1311_v17  ;;  %v1847_v18 = vsub.f32 %v1825_v19, %v1846_v55 }
 0x317   : > { %v1336_v24 = vsel %vm1335_vm10, %v1333_v23, -inf  ;;  %v1848_v26 = vand.u32 4294901760, %v1847_v18 }
 0x318   : > { %1337 = vmax.xlane.f32.xlu1 %v1336_v24 }
 0x319   : > { %v1849_v40 = vsub.f32 %v1847_v18, %v1848_v26 }
 0x331   : > { %2146 = vrot.lane.b32.xlu1 %v4355_v28, %s3813_s16 }
 0x38b   : > { %v1338_v31 = vpop.xlane.xlu1 %1337 }
 0x38c   : > { %v1339_v32 = vsub.f32 %v1333_v23, %v1338_v31 }
 0x38e   : > { %v1340_v36 = vmul.f32 1.442695, %v1339_v32 }
 0x390   : > { %3670 = vpow2.f32 %v1340_v36 }
 0x396   : > { %v4393_v46 = vpop.eup %3670 }
 0x397   : > { %v1343_v54 = vsel %vm1335_vm10, %v4393_v46, 0 }
 0x398   : > { %v1362_v56 = vand.u32 4294901760, %v1343_v54 }
 0x39a   : > { %1393 = vmatmul.f32.vlgmr.msrb.gmra.mxu3 %v1362_v56  ;;  %v1363_v59 = vsub.f32 %v1343_v54, %v1362_v56  ;;  %v1850_v54 = vand.u32 4294901760, %v1849_v40 }
 0x39b   : > { %1597 = vmatpush.xpose.msrb.mxu3 %v4372_v6 }
 0x39c   : > { %1417 = vmatmul.f32.vlgmr.msra.gmra.mxu0 %v1363_v59  ;;  %v1364_v60 = vand.u32 4294901760, %v1363_v59 }
 0x39d   : > { %1623 = vmatpush.xpose.msra.mxu0 %v1548_v12 }
 0x39e   : > { %1441 = vmatmul.f32.vlgmr.msra.gmra.mxu1 %v1364_v60  ;;  %v1365_v1 = vsub.f32 %v1363_v59, %v1364_v60 }
 0x39f   : > { %1645 = vmatpush.xpose.msra.mxu1 %v4372_v6 }
 0x3a0   : > { %v1366_v2 = vand.u32 4294901760, %v1365_v1 }
 0x3a2   : > { %1367 = vmatmul.f32.vlgmr.msrb.gmra.mxu2 %v1366_v2  ;;  %1487 = vmatmul.f32.vlgmr.msra.gmra.mxu3 %v1362_v56 }
 0x3a3   : > { %1574 = vmatpush.xpose.msrb.mxu2 %v4375_v50  ;;  %1710 = vmatpush.msra.mxu3 %v1709_v3  ;;  %v2147_v31 = vpop.permute.xlu1 %2146 }
 0x3a4   : > { %1527 = vmatmul.f32.vlgmr.msrb.gmra.mxu0 %v1526_v4 }
 0x3a5   : > { %1733 = vmatpush.msrb.mxu0 %v1706_v42  ;;  %v2150_v42 = vsel %vm1183_vm9, %v2147_v31, 0 }
 0x3a6   : > { %1553 = vmatmul.f32.vlgmr.msrb.gmra.mxu1 %v1522_v25 }
 0x3a7   : > { %1756 = vmatpush.msrb.mxu1 %v1679_v41 }
 0x3aa   : > { %1465 = vmatmul.f32.vlgmr.msra.gmra.mxu2 %v1362_v56  ;;  %1601 = vmatmul.f32.vlgmr.msrb.gmra.mxu3 %v1524_v38  ;;  %v4417_v56 = vand.u32 4294901760, %v2150_v42 }
 0x3ab   : > { %1680 = vmatpush.msra.mxu2 %v1679_v41  ;;  %1804 = vmatpush.msrb.mxu3 %v1679_v41 }
 0x3ac   : > { %1625 = vmatmul.f32.vlgmr.msra.gmra.mxu0 %v1522_v25  ;;  %v4420_v62 = vsub.f32 %v2150_v42, %v4417_v56 }
 0x3ae   : > { %1647 = vmatmul.f32.vlgmr.msra.gmra.mxu1 %v1522_v25  ;;  %v2195_v3 = vand.u32 4294901760, %v4420_v62 }
 0x3b2   : > { %1577 = vmatmul.f32.vlgmr.msrb.gmra.mxu2 %v1523_v33 }
 0x3b3   : > { %1782 = vmatpush.msrb.mxu2 %v1707_v58 }
 0x419   : > { %v1418_v5 = vpop.f32.mrf.mxu0 }
 0x41b   : > { %v1442_v9 = vpop.f32.mrf.mxu1 }
 0x41d   : > { %v1394_v6 = vpop.f32.mrf.mxu3 }
 0x421   : > { %v1528_v57 = vpop.f32.mrf.mxu0 }
 0x422   : > { %v1529_v21 = vadd.f32 %v1528_v57, %v4386_v47 }
 0x423   : > { %v1554_v22 = vpop.f32.mrf.mxu1 }
 0x424   : > { %v1555_v27 = vadd.f32 %v1554_v22, %v1529_v21 }
 0x425   : > { %v1368_v7 = vpop.f32.mrf.mxu2  ;;  %v1488_v13 = vpop.f32.mrf.mxu3 }
 0x426   : > { %v1395_v8 = vadd.f32 %v1394_v6, %v1368_v7  ;;  %v2196_v6 = vsub.f32 %v4420_v62, %v2195_v3 }
 0x428   : > { %v1419_v12 = vadd.f32 %v1418_v5, %v1395_v8  ;;  %v2197_v7 = vand.u32 4294901760, %v2196_v6 }
 0x429   : > { %v1626_v20 = vpop.f32.mrf.mxu0 }
 0x42a   : > { %v1443_v50 = vadd.f32 %v1442_v9, %v1419_v12 }
 0x42b   : > { %v1648_v43 = vpop.f32.mrf.mxu1 }
 0x42d   : > { %v1466_v14 = vpop.f32.mrf.mxu2  ;;  %v1602_v35 = vpop.f32.mrf.mxu3 }
 0x42e   : > { %v1467_v15 = vadd.f32 %v1466_v14, %v1443_v50 }
 0x430   : > { %v4403_v63 = vadd.f32 %v1488_v13, %v1467_v15 }
 0x435   : > { %v1578_v29 = vpop.f32.mrf.mxu2 }
 0x436   : > { %v1579_v30 = vadd.f32 %v1578_v29, %v1555_v27 }
 0x438   : > { %v1603_v37 = vadd.f32 %v1602_v35, %v1579_v30 }
 0x43a   : > { %v1627_v39 = vadd.f32 %v1626_v20, %v1603_v37 }
 0x43c   : > { %v1649_v44 = vadd.f32 %v1648_v43, %v1627_v39 }
 0x43e   : > { %v1651_v48 = vsel %vm1335_vm10, %v1649_v44, -inf }
 0x43f   : > { %1652 = vmax.xlane.f32.xlu0 %v1651_v48 }
 0x453   : > { %1823 = vrot.lane.b32.xlu0 %v4355_v28, %s3814_s21 }
 0x45b   : > { %1981 = vrot.lane.b32.xlu0 %v4364_v45, %s3812_s24 }
 0x463   : > { %2144 = vrot.lane.b32.xlu0 %v4361_v61, %s3815_s14 }
 0x4b2   : > { %v1653_v49 = vpop.xlane.xlu0 %1652 }
 0x4b3   : > { %v1654_v51 = vsub.f32 %v1649_v44, %v1653_v49 }
 0x4b5   : > { %v1655_v53 = vmul.f32 1.442695, %v1654_v51 }
 0x4b7   : > { %3672 = vpow2.f32 %v1655_v53 }
 0x4bd   : > { %v3673_v11 = vpop.eup %3672 }
 0x4be   : > { %v1810_v17 = vsel %vm1335_vm10, %v3673_v11, 0.0  ;;  %v1662_v28 = vsel %vm1335_vm10, %v3673_v11, 0 }
 0x4bf   : > { %1811 = vadd.xlane.f32.xlu1 %v1810_v17  ;;  %v1681_v23 = vand.u32 4294901760, %v1662_v28 }
 0x4c1   : > { %1712 = vmatmul.f32.vlgmr.msra.gmra.mxu3 %v1681_v23  ;;  %v1682_v24 = vsub.f32 %v1662_v28, %v1681_v23 }
 0x4c3   : > { %1736 = vmatmul.f32.vlgmr.msrb.gmra.mxu0 %v1682_v24  ;;  %v1683_v61 = vand.u32 4294901760, %v1682_v24 }
 0x4c5   : > { %1760 = vmatmul.f32.vlgmr.msrb.gmra.mxu1 %v1683_v61  ;;  %v1824_v32 = vpop.permute.xlu0 %1823  ;;  %v1684_v34 = vsub.f32 %v1682_v24, %v1683_v61 }
 0x4c6   : > { %v1827_v36 = vsel %vm1183_vm9, %v1824_v32, 0 }
 0x4c7   : > { %v1844_v41 = vand.u32 4294901760, %v1827_v36  ;;  %v1685_v25 = vand.u32 4294901760, %v1684_v34 }
 0x4c9   : > { %v1871_v33 = vsub.f32 %v1827_v36, %v1844_v41  ;;  %1686 = vmatmul.f32.vlgmr.msra.gmra.mxu2 %v1685_v25  ;;  %1806 = vmatmul.f32.vlgmr.msrb.gmra.mxu3 %v1681_v23 }
 0x4ca   : > { %1845 = vmatpush.xpose.msra.mxu0 %v1844_v41  ;;  %1921 = vmatpush.xpose.msra.mxu3 %v1844_v41 }
 0x4cb   : > { %v1872_v58 = vand.u32 4294901760, %v1871_v33  ;;  %1898 = vmatpush.xpose.msra.mxu2 %v1871_v33 }
 0x4cd   : > { %v1873_v38 = vsub.f32 %v1871_v33, %v1872_v58  ;;  %1851 = vmatmul.f32.vlgmr.msra.gmra.mxu0 %v1850_v54  ;;  %v1982_v59 = vpop.permute.xlu0 %1981 }
 0x4ce   : > { %1947 = vmatpush.xpose.msrb.mxu0 %v1872_v58  ;;  %v2002_v60 = vand.u32 4294901760, %v1982_v59 }
 0x4cf   : > { %v1874_v0 = vand.u32 4294901760, %v1873_v38 }
 0x4d0   : > { %v2029_v1 = vsub.f32 %v1982_v59, %v2002_v60 }
 0x4d1   : > { %1784 = vmatmul.f32.vlgmr.msrb.gmra.mxu2 %v1681_v23  ;;  %1875 = vmatpush.xpose.msra.mxu1 %v1874_v0 }
 0x4d2   : > { %v2030_v2 = vand.u32 4294901760, %v2029_v1  ;;  %1925 = vmatmul.f32.vlgmr.msra.gmra.mxu3 %v1848_v26  ;;  %2003 = vmatpush.msrb.mxu2 %v2002_v60 }
 0x4d3   : > { %2056 = vmatpush.msra.mxu0 %v2029_v1 }
 0x4d4   : > { %v2031_v4 = vsub.f32 %v2029_v1, %v2030_v2  ;;  %1877 = vmatmul.f32.vlgmr.msra.gmra.mxu1 %v1846_v55 }
 0x4d5   : > { %1969 = vmatpush.xpose.msrb.mxu1 %v1844_v41  ;;  %1949 = vmatmul.f32.vlgmr.msrb.gmra.mxu0 %v1846_v55  ;;  %v2145_v28 = vpop.permute.xlu0 %2144 }
 0x4d6   : > { %v2032_v5 = vand.u32 4294901760, %v2031_v4  ;;  %2168 = vmatpush.xpose.msrb.mxu0 %v4417_v56  ;;  %v2148_v24 = vsel %vm1183_vm9, %v2145_v28, 0 }
 0x4d7   : > { %v2169_v26 = vand.u32 4294901760, %v2148_v24 }
 0x4d8   : > { %2033 = vmatpush.msrb.mxu3 %v2032_v5 }
 0x4d9   : > { %2079 = vmatpush.msra.mxu1 %v2002_v60  ;;  %1901 = vmatmul.f32.vlgmr.msra.gmra.mxu2 %v1847_v18  ;;  %v2170_v34 = vsub.f32 %v2148_v24, %v2169_v26 }
 0x4da   : > { %2127 = vmatpush.msra.mxu3 %v2002_v60  ;;  %2105 = vmatpush.msra.mxu2 %v2030_v2 }
 0x4db   : > { %v2171_v42 = vand.u32 4294901760, %v2170_v34 }
 0x4dc   : > { %1971 = vmatmul.f32.vlgmr.msrb.gmra.mxu1 %v1846_v55 }
 0x4dd   : > { %2198 = vmatpush.xpose.msrb.mxu1 %v2197_v7  ;;  %v2172_v38 = vsub.f32 %v2170_v34, %v2171_v42 }
 0x4df   : > { %v2173_v1 = vand.u32 4294901760, %v2172_v38 }
 0x532   : > { %v1812_v57 = vpop.xlane.xlu1 %1811 }
 0x533   : > { %3674 = vrcp.f32 %v1812_v57 }
 0x539   : > { %v3675_v35 = vpop.eup %3674 }
 0x540   : > { %v1737_v9 = vpop.f32.mrf.mxu0 }
 0x542   : > { %v1761_v14 = vpop.f32.mrf.mxu1 }
 0x544   : > { %v1713_v8 = vpop.f32.mrf.mxu3 }
 0x54a   : > { %v1852_v29 = vpop.f32.mrf.mxu0 }
 0x54b   : > { %v1853_v20 = vadd.f32 %v1852_v29, %v4386_v47 }
 0x54c   : > { %v1687_v12 = vpop.f32.mrf.mxu2  ;;  %v1807_v21 = vpop.f32.mrf.mxu3 }
 0x54d   : > { %v1714_v50 = vadd.f32 %v1713_v8, %v1687_v12 }
 0x54f   : > { %v1738_v13 = vadd.f32 %v1737_v9, %v1714_v50 }
 0x551   : > { %v1762_v15 = vadd.f32 %v1761_v14, %v1738_v13  ;;  %v1878_v37 = vpop.f32.mrf.mxu1 }
 0x552   : > { %v1879_v43 = vadd.f32 %v1878_v37, %v1853_v20  ;;  %v1950_v52 = vpop.f32.mrf.mxu0 }
 0x554   : > { %v1785_v22 = vpop.f32.mrf.mxu2 }
 0x555   : > { %v1786_v27 = vadd.f32 %v1785_v22, %v1762_v15  ;;  %v1926_v49 = vpop.f32.mrf.mxu3 }
 0x557   : > { %v1808_v30 = vadd.f32 %v1807_v21, %v1786_v27 }
 0x559   : > { %v1814_v39 = vmul.f32 %v3675_v35, %v1808_v30  ;;  %v1972_v19 = vpop.f32.mrf.mxu1 }
 0x55b   : > { %1816 = vrot.lane.b32.xlu1 %v1814_v39, %s3813_s16  ;;  %v1491_v39 = vsel %vm1335_vm10, %v4393_v46, 0.0  ;;  %s5066_s16 = sld [smem:[#allocation22_spill]] }
 0x55c   : > { %v1902_v44 = vpop.f32.mrf.mxu2 }
 0x55d   : > { %v1903_v48 = vadd.f32 %v1902_v44, %v1879_v43 }
 0x55f   : > { %v1927_v51 = vadd.f32 %v1926_v49, %v1903_v48 }
 0x561   : > { %v1951_v53 = vadd.f32 %v1950_v52, %v1927_v51 }
 0x563   : > { %v1973_v55 = vadd.f32 %v1972_v19, %v1951_v53 }
 0x565   : > { %v1975_v11 = vsel %vm1335_vm10, %v1973_v55, -inf }
 0x566   : > { %1976 = vmax.xlane.f32.xlu2 %v1975_v11 }
 0x57e   : > { %2304 = vrot.lane.b32.xlu2 %v4364_v45, %s3815_s14 }
 0x5d9   : > { %v1977_v17 = vpop.xlane.xlu2 %1976 }
 0x5da   : > { %v1978_v18 = vsub.f32 %v1973_v55, %v1977_v17  ;;  %v1817_v17 = vpop.permute.xlu1 %1816 }
 0x5dc   : > { %v1979_v23 = vmul.f32 1.442695, %v1978_v18 }
 0x5de   : > { %3676 = vpow2.f32 %v1979_v23 }
 0x5e1   : > { %v2305_v61 = vpop.permute.xlu2 %2304 }
 0x5e2   : > { %v2325_v31 = vand.u32 4294901760, %v2305_v61 }
 0x5e4   : > { %v3677_v32 = vpop.eup %3676  ;;  %v2352_v36 = vsub.f32 %v2305_v61, %v2325_v31  ;;  %v2474_v61 = vld [vmem:[%s5020_s6 + $0x30] sm:$0xff] }
 0x5e5   : > { %v2133_v40 = vsel %vm1335_vm10, %v3677_v32, 0.0  ;;  %v1985_v41 = vsel %vm1335_vm10, %v3677_v32, 0 }
 0x5e6   : > { %2134 = vadd.xlane.f32.xlu2 %v2133_v40  ;;  %v2004_v25 = vand.u32 4294901760, %v1985_v41  ;;  %v2353_v45 = vand.u32 4294901760, %v2352_v36  ;;  %v2472_v40 = vld [vmem:[%s5020_s6 + $0x20] sm:$0xff] }
 0x5e8   : > { %2035 = vmatmul.f32.vlgmr.msrb.gmra.mxu3 %v2004_v25  ;;  %v2005_v33 = vsub.f32 %v1985_v41, %v2004_v25  ;;  %v2354_v58 = vsub.f32 %v2352_v36, %v2353_v45  ;;  %v2471_v41 = vld [vmem:[%s5020_s6 + $0x18] sm:$0xff] }
 0x5e9   : > { %2244 = vmatpush.xpose.msrb.mxu3 %v4417_v56 }
 0x5ea   : > { %2059 = vmatmul.f32.vlgmr.msra.gmra.mxu0 %v2005_v33  ;;  %v2006_v54 = vand.u32 4294901760, %v2005_v33  ;;  %v2355_v0 = vand.u32 4294901760, %v2354_v58 }
 0x5eb   : > { %2270 = vmatpush.xpose.msra.mxu0 %v2195_v3 }
 0x5ec   : > { %2083 = vmatmul.f32.vlgmr.msra.gmra.mxu1 %v2006_v54  ;;  %v2007_v59 = vsub.f32 %v2005_v33, %v2006_v54  ;;  %v4475_v33 = vand.u32 4294901760, %v2471_v41 }
 0x5ed   : > { %2292 = vmatpush.xpose.msra.mxu1 %v4417_v56 }
 0x5ee   : > { %v2008_v60 = vand.u32 4294901760, %v2007_v59 }
 0x5f0   : > { %2009 = vmatmul.f32.vlgmr.msrb.gmra.mxu2 %v2008_v60  ;;  %2129 = vmatmul.f32.vlgmr.msra.gmra.mxu3 %v2004_v25 }
 0x5f1   : > { %2221 = vmatpush.xpose.msrb.mxu2 %v4420_v62  ;;  %2356 = vmatpush.msra.mxu3 %v2355_v0  ;;  %v4494_v0 = vsub.f32 %v2471_v41, %v4475_v33 }
 0x5f2   : > { %2174 = vmatmul.f32.vlgmr.msrb.gmra.mxu0 %v2173_v1 }
 0x5f3   : > { %2379 = vmatpush.msrb.mxu0 %v2352_v36 }
 0x5f4   : > { %2200 = vmatmul.f32.vlgmr.msrb.gmra.mxu1 %v2169_v26 }
 0x5f5   : > { %2402 = vmatpush.msrb.mxu1 %v2325_v31 }
 0x5f8   : > { %2107 = vmatmul.f32.vlgmr.msra.gmra.mxu2 %v2004_v25  ;;  %2248 = vmatmul.f32.vlgmr.msrb.gmra.mxu3 %v2171_v42  ;;  %v2470_v25 = vld [vmem:[%s5020_s6 + $0x10] sm:$0xff]  ;;  %v4473_v42 = vand.u32 4294901760, %v2472_v40 }
 0x5f9   : > { %2326 = vmatpush.msra.mxu2 %v2325_v31  ;;  %2450 = vmatpush.msrb.mxu3 %v2325_v31  ;;  %v2473_v31 = vld [vmem:[%s5020_s6 + $0x28] sm:$0xff]  ;;  %v4477_v54 = vand.u32 4294901760, %v2470_v25 }
 0x5fa   : > { %2272 = vmatmul.f32.vlgmr.msra.gmra.mxu0 %v2169_v26  ;;  %v4462_v36 = vand.u32 4294901760, %v2473_v31  ;;  %v4491_v60 = vsub.f32 %v2472_v40, %v4473_v42 }
 0x5fc   : > { %2294 = vmatmul.f32.vlgmr.msra.gmra.mxu1 %v2169_v26  ;;  %v4486_v59 = vsub.f32 %v2473_v31, %v4462_v36 }
 0x600   : > { %2224 = vmatmul.f32.vlgmr.msrb.gmra.mxu2 %v2170_v34  ;;  %v4460_v34 = vand.u32 4294901760, %v2474_v61 }
 0x601   : > { %2428 = vmatpush.msrb.mxu2 %v2353_v45 }
 0x602   : > { %v4483_v38 = vsub.f32 %v2474_v61, %v4460_v34 }
 0x659   : > { %v2135_v18 = vpop.xlane.xlu2 %2134 }
 0x667   : > { %v2060_v56 = vpop.f32.mrf.mxu0 }
 0x669   : > { %v2084_v5 = vpop.f32.mrf.mxu1 }
 0x66b   : > { %v2036_v2 = vpop.f32.mrf.mxu3 }
 0x66f   : > { %v2175_v7 = vpop.f32.mrf.mxu0 }
 0x670   : > { %v2176_v50 = vadd.f32 %v2175_v7, %v4386_v47  ;;  %v2550_v7 = vand.u32 4294901760, %v4494_v0 }
 0x671   : > { %v2201_v13 = vpop.f32.mrf.mxu1 }
 0x672   : > { %v2202_v14 = vadd.f32 %v2201_v13, %v2176_v50 }
 0x673   : > { %v2010_v3 = vpop.f32.mrf.mxu2  ;;  %v2130_v8 = vpop.f32.mrf.mxu3 }
 0x674   : > { %v2037_v4 = vadd.f32 %v2036_v2, %v2010_v3  ;;  %v2538_v2 = vand.u32 4294901760, %v4486_v59  ;;  %v4502_v3 = vsub.f32 %v2470_v25, %v4477_v54 }
 0x676   : > { %v2061_v6 = vadd.f32 %v2060_v56, %v2037_v4  ;;  %v2532_v56 = vand.u32 4294901760, %v4483_v38  ;;  %v2544_v4 = vand.u32 4294901760, %v4491_v60  ;;  %v2556_v50 = vand.u32 4294901760, %v4502_v3 }
 0x677   : > { %v2273_v29 = vpop.f32.mrf.mxu0 }
 0x678   : > { %v2085_v62 = vadd.f32 %v2084_v5, %v2061_v6  ;;  %v2533_v6 = vsub.f32 %v4483_v38, %v2532_v56 }
 0x679   : > { %v2295_v35 = vpop.f32.mrf.mxu1 }
 0x67b   : > { %v2108_v9 = vpop.f32.mrf.mxu2  ;;  %v2249_v22 = vpop.f32.mrf.mxu3 }
 0x67c   : > { %v2109_v12 = vadd.f32 %v2108_v9, %v2085_v62  ;;  %v2539_v62 = vsub.f32 %v4486_v59, %v2538_v2  ;;  %v2534_v9 = vand.u32 4294901760, %v2533_v6 }
 0x67e   : > { %v2131_v57 = vadd.f32 %v2130_v8, %v2109_v12  ;;  %v2545_v12 = vsub.f32 %v4491_v60, %v2544_v4  ;;  %v2540_v13 = vand.u32 4294901760, %v2539_v62 }
 0x683   : > { %v2225_v15 = vpop.f32.mrf.mxu2 }
 0x684   : > { %v2226_v21 = vadd.f32 %v2225_v15, %v2202_v14  ;;  %v2551_v14 = vsub.f32 %v4494_v0, %v2550_v7  ;;  %v2546_v15 = vand.u32 4294901760, %v2545_v12 }
 0x686   : > { %v2250_v27 = vadd.f32 %v2249_v22, %v2226_v21  ;;  %v2557_v21 = vsub.f32 %v4502_v3, %v2556_v50  ;;  %v2552_v22 = vand.u32 4294901760, %v2551_v14 }
 0x688   : > { %v2274_v30 = vadd.f32 %v2273_v29, %v2250_v27 }
 0x68a   : > { %v2296_v37 = vadd.f32 %v2295_v35, %v2274_v30  ;;  %v2558_v30 = vand.u32 4294901760, %v2557_v21 }
 0x68c   : > { %v2298_v20 = vsel %vm1335_vm10, %v2296_v37, -inf }
 0x68d   : > { %2299 = vmax.xlane.f32.xlu0 %v2298_v20 }
 0x695   : > { %1492 = vadd.xlane.f32.xlu0 %v1491_v39 }
 0x700   : > { %v2300_v43 = vpop.xlane.xlu0 %2299 }
 0x701   : > { %v2301_v47 = vsub.f32 %v2296_v37, %v2300_v43 }
 0x703   : > { %v2302_v44 = vmul.f32 1.442695, %v2301_v47 }
 0x705   : > { %3678 = vpow2.f32 %v2302_v44 }
 0x708   : > { %v1493_v48 = vpop.xlane.xlu0 %1492 }
 0x709   : > { %3680 = vrcp.f32 %v1493_v48 }
 0x70a   : > { %3682 = vrcp.f32 %v2135_v18 }
 0x70b   : > { %v3679_v49 = vpop.eup %3678 }
 0x70c   : > { %v2456_v51 = vsel %vm1335_vm10, %v3679_v49, 0.0  ;;  %v2308_v52 = vsel %vm1335_vm10, %v3679_v49, 0 }
 0x70d   : > { %2457 = vadd.xlane.f32.xlu0 %v2456_v51  ;;  %v2327_v53 = vand.u32 4294901760, %v2308_v52 }
 0x70f   : > { %v3681_v19 = vpop.eup %3680  ;;  %2358 = vmatmul.f32.vlgmr.msra.gmra.mxu3 %v2327_v53  ;;  %v2328_v55 = vsub.f32 %v2308_v52, %v2327_v53 }
 0x710   : > { %v1495_v11 = vmul.f32 %v3681_v19, %v4403_v63  ;;  %v3683_v24 = vpop.eup %3682  ;;  %v2475_v63 = vld [vmem:[%s5020_s6 + $0x38] sm:$0xff] }
 0x711   : > { %2382 = vmatmul.f32.vlgmr.msrb.gmra.mxu0 %v2328_v55  ;;  %v2329_v46 = vand.u32 4294901760, %v2328_v55  ;;  %v2137_v26 = vmul.f32 %v3683_v24, %v2131_v57  ;;  %v4458_v32 = vand.u32 4294901760, %v2475_v63 }
 0x712   : > { %1496 = vst.msk [vmem:[#allocation2] sm:$0xff] %vm1183_vm9, %v1495_v11 }
 0x713   : > { %2406 = vmatmul.f32.vlgmr.msrb.gmra.mxu1 %v2329_v46  ;;  %v2330_v28 = vsub.f32 %v2328_v55, %v2329_v46  ;;  %1820 = vst.msk [vmem:[#allocation2] sm:$0xff] %vm1819_vm11, %v1817_v17  ;;  %v4480_v58 = vsub.f32 %v2475_v63, %v4458_v32  ;;  %2492 = vmatpush.msra.mxu0 %v4458_v32  ;;  %v2468_v55 = vld [vmem:[%s5020_s6] sm:$0xff] }
 0x714   : > { %2624 = vmatpush.msra.mxu3 %v4458_v32  ;;  %v2505_v46 = vand.u32 4294901760, %v2468_v55 }
 0x715   : > { %v2331_v23 = vand.u32 4294901760, %v2330_v28  ;;  %v2526_v1 = vand.u32 4294901760, %v4480_v58  ;;  %2494 = vmatpush.msra.mxu0 %v4460_v34 }
 0x716   : > { %2626 = vmatpush.msra.mxu3 %v4460_v34  ;;  %v2567_v28 = vsub.f32 %v2468_v55, %v2505_v46 }
 0x717   : > { %2332 = vmatmul.f32.vlgmr.msra.gmra.mxu2 %v2331_v23  ;;  %2452 = vmatmul.f32.vlgmr.msrb.gmra.mxu3 %v2327_v53  ;;  %v2527_v5 = vsub.f32 %v4480_v58, %v2526_v1 }
 0x718   : > { %2587 = vmatpush.msra.mxu2 %v4480_v58  ;;  %2496 = vmatpush.msra.mxu0 %v4462_v36  ;;  %v2568_v23 = vand.u32 4294901760, %v2567_v28 }
 0x719   : > { %2628 = vmatpush.msra.mxu3 %v4462_v36  ;;  %v2528_v8 = vand.u32 4294901760, %v2527_v5 }
 0x71a   : > { %2590 = vmatpush.msra.mxu2 %v4483_v38  ;;  %2498 = vmatpush.msra.mxu0 %v4473_v42 }
 0x71b   : > { %2630 = vmatpush.msra.mxu3 %v4473_v42  ;;  %2529 = vmatpush.msra.mxu1 %v2528_v8 }
 0x71c   : > { %2593 = vmatpush.msra.mxu2 %v4486_v59  ;;  %2500 = vmatpush.msra.mxu0 %v4475_v33 }
 0x71d   : > { %2632 = vmatpush.msra.mxu3 %v4475_v33  ;;  %2535 = vmatpush.msra.mxu1 %v2534_v9 }
 0x71e   : > { %2596 = vmatpush.msra.mxu2 %v4491_v60  ;;  %2502 = vmatpush.msra.mxu0 %v4477_v54 }
 0x71f   : > { %2430 = vmatmul.f32.vlgmr.msrb.gmra.mxu2 %v2327_v53  ;;  %2634 = vmatpush.msra.mxu3 %v4477_v54  ;;  %v2469_v53 = vld [vmem:[%s5020_s6 + $0x8] sm:$0xff] }
 0x720   : > { %2599 = vmatpush.msra.mxu2 %v4494_v0  ;;  %2541 = vmatpush.msra.mxu1 %v2540_v13  ;;  %v2503_v19 = vand.u32 4294901760, %v2469_v53 }
 0x721   : > { %2139 = vrot.lane.b32.xlu0 %v2137_v26, %s3814_s21  ;;  %v2569_v26 = vsub.f32 %v2567_v28, %v2568_v23 }
 0x722   : > { %2602 = vmatpush.msra.mxu2 %v4502_v3  ;;  %2547 = vmatpush.msra.mxu1 %v2546_v15  ;;  %v2561_v11 = vsub.f32 %v2469_v53, %v2503_v19  ;;  %v3661_v53 = vld [vmem:[%s5067_s29] ss:$0 sm:$0xff] }
 0x723   : > { %2504 = vmatpush.msra.mxu0 %v2503_v19  ;;  %2636 = vmatpush.msra.mxu3 %v2503_v19  ;;  %v2570_v63 = vand.u32 4294901760, %v2569_v26 }
 0x724   : > { %2553 = vmatpush.msra.mxu1 %v2552_v22  ;;  %v2562_v17 = vand.u32 4294901760, %v2561_v11  ;;  %2605 = vmatpush.msra.mxu2 %v2561_v11 }
 0x725   : > { %2506 = vmatpush.msra.mxu0 %v2505_v46  ;;  %2638 = vmatpush.msra.mxu3 %v2505_v46 }
 0x726   : > { %2559 = vmatpush.msra.mxu1 %v2558_v30  ;;  %v2563_v18 = vsub.f32 %v2561_v11, %v2562_v17  ;;  %2608 = vmatpush.msra.mxu2 %v2567_v28 }
 0x727   : > { %2657 = vmatpush.msrb.mxu0 %v2526_v1 }
 0x728   : > { %v2564_v24 = vand.u32 4294901760, %v2563_v18 }
 0x729   : > { %2661 = vmatpush.msrb.mxu0 %v2532_v56 }
 0x72a   : > { %2565 = vmatpush.msra.mxu1 %v2564_v24 }
 0x72b   : > { %2665 = vmatpush.msrb.mxu0 %v2538_v2 }
 0x72c   : > { %2571 = vmatpush.msra.mxu1 %v2570_v63 }
 0x72d   : > { %2669 = vmatpush.msrb.mxu0 %v2544_v4  ;;  %v3690_v4 = vld [vmem:[%s4007_s9] sm:$0xff] }
 0x72e   : > { %2700 = vmatpush.msrb.mxu1 %v4458_v32 }
 0x72f   : > { %2673 = vmatpush.msrb.mxu0 %v2550_v7 }
 0x730   : > { %2702 = vmatpush.msrb.mxu1 %v4460_v34 }
 0x731   : > { %2677 = vmatpush.msrb.mxu0 %v2556_v50 }
 0x732   : > { %2704 = vmatpush.msrb.mxu1 %v4462_v36 }
 0x733   : > { %2681 = vmatpush.msrb.mxu0 %v2562_v17 }
 0x734   : > { %2706 = vmatpush.msrb.mxu1 %v4473_v42 }
 0x735   : > { %2685 = vmatpush.msrb.mxu0 %v2568_v23 }
 0x736   : > { %2708 = vmatpush.msrb.mxu1 %v4475_v33 }
 0x738   : > { %2710 = vmatpush.msrb.mxu1 %v4477_v54 }
 0x73a   : > { %2712 = vmatpush.msrb.mxu1 %v2503_v19 }
 0x73c   : > { %2714 = vmatpush.msrb.mxu1 %v2505_v46 }
 0x780   : > { %v2458_v45 = vpop.xlane.xlu0 %2457 }
 0x781   : > { %3684 = vrcp.f32 %v2458_v45  ;;  %v3659_v45 = vld [vmem:[%s5065_s23] ss:$0 sm:$0xff] }
 0x787   : > { %v3685_v51 = vpop.eup %3684 }
 0x78e   : > { %v2383_v37 = vpop.f32.mrf.mxu0 }
 0x790   : > { %v2407_v39 = vpop.f32.mrf.mxu1 }
 0x792   : > { %v2359_v27 = vpop.f32.mrf.mxu3 }
 0x793   : > { %v2140_v57 = vpop.permute.xlu0 %2139 }
 0x794   : > { %2143 = vst.msk [vmem:[#allocation2] sm:$0xff] %vm2142_vm12, %v2140_v57 }
 0x79a   : > { %v2333_v29 = vpop.f32.mrf.mxu2  ;;  %v2453_v48 = vpop.f32.mrf.mxu3 }
 0x79b   : > { %v2360_v35 = vadd.f32 %v2359_v27, %v2333_v29 }
 0x79d   : > { %v2384_v20 = vadd.f32 %v2383_v37, %v2360_v35 }
 0x79f   : > { %v2408_v43 = vadd.f32 %v2407_v39, %v2384_v20 }
 0x7a2   : > { %v2431_v47 = vpop.f32.mrf.mxu2 }
 0x7a3   : > { %v2432_v44 = vadd.f32 %v2431_v47, %v2408_v43 }
 0x7a5   : > { %v2454_v49 = vadd.f32 %v2453_v48, %v2432_v44 }
 0x7a7   : > { %v2460_v52 = vmul.f32 %v3685_v51, %v2454_v49 }
 0x7a9   : > { %2462 = vrot.lane.b32.xlu0 %v2460_v52, %s3809_s28 }
 0x81b   : > { %v2463_v61 = vpop.permute.xlu0 %2462 }
 0x81c   : > { %2466 = vst.msk [vmem:[#allocation2] sm:$0xff] %vm2465_vm13, %v2463_v61 }
 0x823   : > { %v2467_v31 = vld [vmem:[#allocation2] sm:$0xff] }
 0x824   : > { %v2481_v32 = vsel %vm618_vm0, %v2467_v31, 0 }
 0x825   : > { %v2507_v34 = vand.u32 4294901760, %v2481_v32 }
 0x827   : > { %2573 = vmatmul.f32.vlgmr.msra.gmra.mxu1 %v2507_v34  ;;  %v2508_v40 = vsub.f32 %v2481_v32, %v2507_v34 }
 0x829   : > { %2611 = vmatmul.f32.vlgmr.msra.gmra.mxu2 %v2508_v40  ;;  %v2509_v36 = vand.u32 4294901760, %v2508_v40 }
 0x82b   : > { %2642 = vmatmul.f32.vlgmr.msra.gmra.mxu3 %v2509_v36  ;;  %v2510_v41 = vsub.f32 %v2508_v40, %v2509_v36 }
 0x82d   : > { %v2511_v25 = vand.u32 4294901760, %v2510_v41 }
 0x82f   : > { %2512 = vmatmul.f32.vlgmr.msra.gmra.mxu0 %v2511_v25  ;;  %2716 = vmatmul.f32.vlgmr.msrb.gmra.mxu1 %v2507_v34 }
 0x837   : > { %2687 = vmatmul.f32.vlgmr.msrb.gmra.mxu0 %v2507_v34 }
 0x8a4   : > { %v2574_v42 = vpop.f32.mrf.mxu1 }
 0x8ac   : > { %v2513_v33 = vpop.f32.mrf.mxu0  ;;  %v2612_v38 = vpop.f32.mrf.mxu2 }
 0x8ad   : > { %v2514_v54 = vadd.f32 %v3659_v45, %v2513_v33  ;;  %v2717_v2 = vpop.f32.mrf.mxu1 }
 0x8ae   : > { %v2643_v60 = vpop.f32.mrf.mxu3 }
 0x8af   : > { %v2575_v58 = vadd.f32 %v2574_v42, %v2514_v54 }
 0x8b1   : > { %v2613_v59 = vadd.f32 %v2612_v38, %v2575_v58 }
 0x8b3   : > { %v2644_v0 = vadd.f32 %v2643_v60, %v2613_v59 }
 0x8b4   : > { %v2688_v1 = vpop.f32.mrf.mxu0 }
 0x8b5   : > { %v2689_v56 = vadd.f32 %v2688_v1, %v2644_v0 }
 0x8b7   : > { %v2718_v3 = vadd.f32 %v2717_v2, %v2689_v56 }
 0x8b9   : > { %v2720_v5 = vadd.f32 %v3690_v4, %v2718_v3 }
 0x8bb   : > { %2721 = vst.msk [vmem:[#allocation4] sm:$0xff] %vm618_vm0, %v2720_v5  ;;  %v2724_v6 = vsel %vm618_vm0, %v2720_v5, 0.0 }
 0x8bc   : > { %2725 = vadd.xlane.f32.xlu2 %v2724_v6 }
 0x92f   : > { %v2726_v62 = vpop.xlane.xlu2 %2725 }
 0x930   : > { %v2727_v7 = vmul.f32 %v2726_v62, %v4029_v16 }
 0x932   : > { %v2728_v8 = vsub.f32 %v2720_v5, %v2727_v7 }
 0x934   : > { %v2729_v9 = vmul.f32 %v2728_v8, %v2728_v8 }
 0x936   : > { %v2730_v12 = vsel %vm618_vm0, %v2729_v9, 0.0 }
 0x937   : > { %2731 = vadd.xlane.f32.xlu1 %v2730_v12 }
 0x9aa   : > { %v2732_v50 = vpop.xlane.xlu1 %2731 }
 0x9ab   : > { %v2733_v57 = vmul.f32 %v2732_v50, %v4163_v10  ;;  %v3660_v10 = vld [vmem:[%s5066_s16] ss:$0 sm:$0xff] }
 0x9ac   : > { %v2749_v52 = vmul.f32 %v3660_v10, %v2728_v8 }
 0x9ad   : > { %3686 = vrsqrt.f32 %v2733_v57  ;;  %vm2741_vm14 = vcmp.eq.f32.partialorder %v2733_v57, inf  ;;  %v2744_v30 = vand.u32 2147483648, %v2733_v57  ;;  %vm2743_vm15 = vcmp.eq.f32.partialorder %v2733_v57, 0.0 }
 0x9b3   : > { %v3687_v13 = vpop.eup %3686 }
 0x9b4   : > { %v2735_v14 = vmul.f32 %v3687_v13, %v2733_v57 }
 0x9b6   : > { %v2736_v15 = vmul.f32 %v3687_v13, %v2735_v14 }
 0x9b8   : > { %v2737_v21 = vmul.f32 0.5, %v2736_v15 }
 0x9ba   : > { %v2738_v22 = vsub.f32 1.5, %v2737_v21 }
 0x9bc   : > { %v2739_v27 = vmul.f32 %v3687_v13, %v2738_v22 }
 0x9be   : > { %v2740_v29 = vmul.f32 %v2739_v27, %v2733_v57 }
 0x9c0   : > { %v2742_v35 = vsel %vm2741_vm14, %v2733_v57, %v2740_v29 }
 0x9c1   : > { %v2745_v16 = vsel %vm2743_vm15, %v2744_v30, %v2742_v35 }
 0x9c2   : > { %v2750_v37 = vadd.f32 1e-06, %v2745_v16 }
 0x9c4   : > { %3688 = vrcp.f32 %v2750_v37  ;;  %v2762_v47 = vand.u32 2147483648, %v2750_v37  ;;  %v2760_v48 = vand.u32 2147483647, %v2750_v37  ;;  %vm2756_vm2 = vweird.f32 %v2750_v37 }
 0x9c6   : > { %v2763_v51 = vor.u32 1.1754944e-38, %v2762_v47  ;;  %vm2761_vm4 = vcmp.eq.f32.partialorder %v2760_v48, 8.507059e+37 }
 0x9ca   : > { %v3689_v20 = vpop.eup %3688 }
 0x9cb   : > { %v2752_v39 = vmul.f32 %v3689_v20, %v2750_v37  ;;  %vm2757_vm1 = vweird.f32 %v3689_v20 }
 0x9cc   : > { %vm2758_vm3 = vmor %vm2756_vm2, %vm2757_vm1 }
 0x9cd   : > { %v2753_v43 = vsub.f32 1.0, %v2752_v39 }
 0x9cf   : > { %v2754_v44 = vmul.f32 %v3689_v20, %v2753_v43 }
 0x9d1   : > { %v2755_v49 = vadd.f32 %v3689_v20, %v2754_v44 }
 0x9d3   : > { %v2759_v19 = vsel %vm2758_vm3, %v3689_v20, %v2755_v49 }
 0x9d4   : > { %v2764_v55 = vsel %vm2761_vm4, %v2763_v51, %v2759_v19 }
 0x9d5   : > { %v2765_v11 = vmul.f32 %v2764_v55, %v2749_v52 }
 0x9d7   : > { %v2769_v46 = vadd.f32 %v3661_v53, %v2765_v11 }
 0x9d9   : > { %2770 = vst.msk [vmem:[#allocation3] sm:$0xff] %vm618_vm0, %v2769_v46 }
 0x9da PF: > { %v2779_v17 = vld [vmem:[%s4023_s7 + $0x38] sm:$0xff]  ;;  %v2778_v28 = vld [vmem:[%s4023_s7 + $0x30] sm:$0xff]  ;;  %v2777_v18 = vld [vmem:[%s4023_s7 + $0x28] sm:$0xff]  ;;  %vm2784_vm0 = vcmask 523264   ;;  %p3556_p7 = scmp.ne.s32.totalorder %s3789_s18, 1 }
 0x9db   : > { %v4584_v23 = vand.u32 4294901760, %v2779_v17  ;;  %v4586_v24 = vand.u32 4294901760, %v2778_v28  ;;  %v4588_v26 = vand.u32 4294901760, %v2777_v18  ;;  %v2776_v63 = vld [vmem:[%s4023_s7 + $0x20] sm:$0xff]  ;;  %v2775_v61 = vld [vmem:[%s4023_s7 + $0x18] sm:$0xff]  ;;  %v2774_v31 = vld [vmem:[%s4023_s7 + $0x10] sm:$0xff] }
 0x9dc   : > { %v4593_v32 = vand.u32 4294901760, %v2776_v63  ;;  %v4595_v34 = vand.u32 4294901760, %v2775_v61  ;;  %v4597_v40 = vand.u32 4294901760, %v2774_v31  ;;  %v2773_v36 = vld [vmem:[%s4023_s7 + $0x8] sm:$0xff]  ;;  %v2772_v41 = vld [vmem:[%s4023_s7] sm:$0xff]  ;;  %v3049_v13 = vld [vmem:[%s4021_s27 + $0x70] sm:$0xff] }
 0x9dd   : > { %2797 = vmatpush.msra.mxu0 %v4584_v23  ;;  %v4603_v25 = vsub.f32 %v2779_v17, %v4584_v23  ;;  %v4606_v45 = vsub.f32 %v2778_v28, %v4586_v24  ;;  %v4609_v42 = vsub.f32 %v2777_v18, %v4588_v26  ;;  %2929 = vmatpush.msra.mxu3 %v4584_v23  ;;  %v4612_v33 = vand.u32 4294901760, %v2773_v36  ;;  %v3050_v57 = vld [vmem:[%s4021_s27 + $0x78] sm:$0xff]  ;;  %v3048_v14 = vld [vmem:[%s4021_s27 + $0x68] sm:$0xff]  ;;  %v3047_v27 = vld [vmem:[%s4021_s27 + $0x60] sm:$0xff]  ;;  %s5068_s17 = sld [smem:[#allocation25_spill]] (!%p3556_p7) }
 0x9de   : > { %v4615_v54 = vsub.f32 %v2776_v63, %v4593_v32  ;;  %v4618_v58 = vsub.f32 %v2775_v61, %v4595_v34  ;;  %v4621_v38 = vsub.f32 %v2774_v31, %v4597_v40  ;;  %v4623_v59 = vand.u32 4294901760, %v2772_v41  ;;  %v3046_v29 = vld [vmem:[%s4021_s27 + $0x58] sm:$0xff]  ;;  %v3045_v10 = vld [vmem:[%s4021_s27 + $0x50] sm:$0xff]  ;;  %v3044_v52 = vld [vmem:[%s4021_s27 + $0x48] sm:$0xff] }
 0x9df   : > { %2799 = vmatpush.msra.mxu0 %v4586_v24  ;;  %v2831_v60 = vand.u32 4294901760, %v4603_v25  ;;  %v2837_v0 = vand.u32 4294901760, %v4606_v45  ;;  %2892 = vmatpush.msra.mxu2 %v4603_v25  ;;  %v2843_v1 = vand.u32 4294901760, %v4609_v42  ;;  %v4635_v4 = vsub.f32 %v2773_v36, %v4612_v33 }
 0x9e0   : > { %v2849_v56 = vand.u32 4294901760, %v4615_v54  ;;  %2931 = vmatpush.msra.mxu3 %v4586_v24  ;;  %v2855_v2 = vand.u32 4294901760, %v4618_v58  ;;  %v2861_v3 = vand.u32 4294901760, %v4621_v38  ;;  %v4650_v7 = vsub.f32 %v2772_v41, %v4623_v59  ;;  %v2771_v8 = vld [vmem:[#allocation3] sm:$0xff] }
 0x9e1   : > { %v2832_v5 = vsub.f32 %v4603_v25, %v2831_v60  ;;  %2801 = vmatpush.msra.mxu0 %v4588_v26  ;;  %v2838_v6 = vsub.f32 %v4606_v45, %v2837_v0  ;;  %v2844_v62 = vsub.f32 %v4609_v42, %v2843_v1  ;;  %2895 = vmatpush.msra.mxu2 %v4606_v45  ;;  %v2867_v22 = vand.u32 4294901760, %v4635_v4 }
 0x9e2   : > { %2933 = vmatpush.msra.mxu3 %v4588_v26  ;;  %v2850_v50 = vsub.f32 %v4615_v54, %v2849_v56  ;;  %v2856_v15 = vsub.f32 %v4618_v58, %v2855_v2  ;;  %v4666_v21 = vsub.f32 %v4621_v38, %v2861_v3  ;;  %v2786_v35 = vsel %vm2784_vm0, %v2771_v8, 0  ;;  %v3043_v8 = vld [vmem:[%s4021_s27 + $0x40] sm:$0xff] }
 0x9e3   : > { %v2833_v9 = vand.u32 4294901760, %v2832_v5  ;;  %v2839_v12 = vand.u32 4294901760, %v2838_v6  ;;  %2803 = vmatpush.msra.mxu0 %v4593_v32  ;;  %2898 = vmatpush.msra.mxu2 %v4609_v42  ;;  %v2845_v30 = vand.u32 4294901760, %v2844_v62  ;;  %v4674_v16 = vand.u32 4294901760, %v3050_v57 }
 0x9e4   : > { %2935 = vmatpush.msra.mxu3 %v4593_v32  ;;  %v4676_v37 = vand.u32 4294901760, %v3049_v13  ;;  %v2873_v20 = vand.u32 4294901760, %v4650_v7  ;;  %v4681_v39 = vand.u32 4294901760, %v2786_v35  ;;  %v4683_v43 = vand.u32 4294901760, %v3048_v14 }
 0x9e5   : > { %2834 = vmatpush.msra.mxu1 %v2833_v9  ;;  %2805 = vmatpush.msra.mxu0 %v4595_v34  ;;  %v4685_v47 = vand.u32 4294901760, %v3047_v27  ;;  %v2851_v44 = vand.u32 4294901760, %v2850_v50  ;;  %v4690_v48 = vsub.f32 %v3050_v57, %v4674_v16  ;;  %v4695_v51 = vand.u32 4294901760, %v3046_v29  ;;  %v3042_v9 = vld [vmem:[%s4021_s27 + $0x38] sm:$0xff] }
 0x9e6   : > { %2901 = vmatpush.msra.mxu2 %v4615_v54  ;;  %2937 = vmatpush.msra.mxu3 %v4595_v34  ;;  %v4693_v49 = vsub.f32 %v3049_v13, %v4676_v37  ;;  %v2857_v53 = vand.u32 4294901760, %v2856_v15  ;;  %v2868_v19 = vsub.f32 %v4635_v4, %v2867_v22  ;;  %v2813_v55 = vsub.f32 %v2786_v35, %v4681_v39 }
 0x9e7   : > { %2840 = vmatpush.msra.mxu1 %v2839_v12  ;;  %2807 = vmatpush.msra.mxu0 %v4597_v40  ;;  %v4705_v11 = vsub.f32 %v3048_v14, %v4683_v43  ;;  %v3094_v46 = vand.u32 4294901760, %v4690_v48  ;;  %v4711_v28 = vsub.f32 %v3047_v27, %v4685_v47  ;;  %v4713_v18 = vand.u32 4294901760, %v3045_v10 }
 0x9e8   : > { %2904 = vmatpush.msra.mxu2 %v4618_v58  ;;  %2939 = vmatpush.msra.mxu3 %v4597_v40  ;;  %v3100_v17 = vand.u32 4294901760, %v4693_v49  ;;  %v2874_v63 = vsub.f32 %v4650_v7, %v2873_v20  ;;  %v2814_v61 = vand.u32 4294901760, %v2813_v55  ;;  %v4720_v31 = vand.u32 4294901760, %v3044_v52 }
 0x9e9   : > { %2846 = vmatpush.msra.mxu1 %v2845_v30  ;;  %2809 = vmatpush.msra.mxu0 %v4612_v33  ;;  %v2863_v36 = vand.u32 4294901760, %v4666_v21  ;;  %v3095_v41 = vsub.f32 %v4690_v48, %v3094_v46  ;;  %v3106_v5 = vand.u32 4294901760, %v4705_v11  ;;  %v4729_v6 = vsub.f32 %v3046_v29, %v4695_v51 }
 0x9ea   : > { %2907 = vmatpush.msra.mxu2 %v4621_v38  ;;  %2941 = vmatpush.msra.mxu3 %v4612_v33  ;;  %v2815_v62 = vsub.f32 %v2813_v55, %v2814_v61  ;;  %v2869_v12 = vand.u32 4294901760, %v2868_v19  ;;  %v3101_v50 = vsub.f32 %v4693_v49, %v3100_v17  ;;  %v3112_v57 = vand.u32 4294901760, %v4711_v28 }
 0x9eb   : > { %2852 = vmatpush.msra.mxu1 %v2851_v44  ;;  %2811 = vmatpush.msra.mxu0 %v4623_v59  ;;  %v4742_v13 = vsub.f32 %v3045_v10, %v4713_v18  ;;  %v2875_v25 = vand.u32 4294901760, %v2874_v63  ;;  %v3096_v14 = vand.u32 4294901760, %v3095_v41  ;;  %v4748_v15 = vsub.f32 %v3044_v52, %v4720_v31 }
 0x9ec   : > { %2910 = vmatpush.msra.mxu2 %v4635_v4  ;;  %2943 = vmatpush.msra.mxu3 %v4623_v59  ;;  %v3107_v21 = vsub.f32 %v4705_v11, %v3106_v5  ;;  %v3118_v27 = vand.u32 4294901760, %v4729_v6  ;;  %v4754_v29 = vand.u32 4294901760, %v3043_v8  ;;  %v4756_v30 = vand.u32 4294901760, %v3042_v9 }
 0x9ed   : > { %2962 = vmatpush.msrb.mxu0 %v2831_v60  ;;  %2858 = vmatpush.msra.mxu1 %v2857_v53  ;;  %v2816_v60 = vand.u32 4294901760, %v2815_v62  ;;  %v3102_v45 = vand.u32 4294901760, %v3101_v50  ;;  %v3124_v35 = vand.u32 4294901760, %v4742_v13  ;;  %v3130_v44 = vand.u32 4294901760, %v4748_v15  ;;  %v3037_v62 = vld [vmem:[%s4021_s27 + $0x10] sm:$0xff] }
 0x9ee   : > { %2913 = vmatpush.msra.mxu2 %v4650_v7  ;;  %2947 = vmatmul.f32.vlgmr.msra.gmra.mxu3 %v2814_v61  ;;  %v4765_v10 = vsub.f32 %v3043_v8, %v4754_v29  ;;  %v3108_v42 = vand.u32 4294901760, %v3107_v21  ;;  %v4775_v52 = vsub.f32 %v3042_v9, %v4756_v30 }
 0x9ef   : > { %2966 = vmatpush.msrb.mxu0 %v2837_v0  ;;  %2864 = vmatpush.msra.mxu1 %v2863_v36  ;;  %v3113_v0 = vsub.f32 %v4711_v28, %v3112_v57  ;;  %v3131_v58 = vsub.f32 %v4748_v15, %v3130_v44 }
 0x9f0   : > { %2916 = vmatmul.f32.vlgmr.msra.gmra.mxu2 %v2813_v55  ;;  %2817 = vmatmul.f32.vlgmr.msra.gmra.mxu0 %v2816_v60  ;;  %v3136_v53 = vand.u32 4294901760, %v4765_v10  ;;  %v3038_v55 = vld [vmem:[%s4021_s27 + $0x18] sm:$0xff]  ;;  %v3036_v60 = vld [vmem:[%s4021_s27 + $0x8] sm:$0xff] }
 0x9f1   : > { %2970 = vmatpush.msrb.mxu0 %v2843_v1  ;;  %2870 = vmatpush.msra.mxu1 %v2869_v12  ;;  %v3119_v1 = vsub.f32 %v4729_v6, %v3118_v27  ;;  %v3114_v54 = vand.u32 4294901760, %v3113_v0  ;;  %v4865_v41 = vand.u32 4294901760, %v3038_v55  ;;  %v4888_v0 = vand.u32 4294901760, %v3036_v60 }
 0x9f2   : > { %3097 = vmatpush.msrb.mxu3 %v3096_v14  ;;  %3052 = vmatpush.msrb.mxu2 %v4674_v16  ;;  %v3137_v38 = vsub.f32 %v4765_v10, %v3136_v53 }
 0x9f3   : > { %2974 = vmatpush.msrb.mxu0 %v2849_v56  ;;  %2876 = vmatpush.msra.mxu1 %v2875_v25  ;;  %v3125_v56 = vsub.f32 %v4742_v13, %v3124_v35  ;;  %v4876_v50 = vsub.f32 %v3038_v55, %v4865_v41  ;;  %v4880_v25 = vand.u32 4294901760, %v3037_v62 }
 0x9f4   : > { %2878 = vmatmul.f32.vlgmr.msra.gmra.mxu1 %v4681_v39  ;;  %3103 = vmatpush.msrb.mxu3 %v3102_v45  ;;  %v3138_v4 = vand.u32 4294901760, %v3137_v38 }
 0x9f5   : > { %3005 = vmatpush.msrb.mxu1 %v4584_v23  ;;  %2978 = vmatpush.msrb.mxu0 %v2855_v2  ;;  %v3120_v23 = vand.u32 4294901760, %v3119_v1  ;;  %v3142_v2 = vand.u32 4294901760, %v4775_v52  ;;  %v3166_v45 = vand.u32 4294901760, %v4876_v50  ;;  %v3035_v1 = vld [vmem:[%s4021_s27] sm:$0xff] }
 0x9f6   : > { %3109 = vmatpush.msrb.mxu3 %v3108_v42  ;;  %3054 = vmatpush.msrb.mxu2 %v4676_v37  ;;  %v4892_v42 = vsub.f32 %v3037_v62, %v4880_v25 }
 0x9f7   : > { %3007 = vmatpush.msrb.mxu1 %v4586_v24  ;;  %2982 = vmatpush.msrb.mxu0 %v2861_v3  ;;  %v3126_v24 = vand.u32 4294901760, %v3125_v56  ;;  %v3143_v3 = vsub.f32 %v4775_v52, %v3142_v2  ;;  %v3167_v56 = vsub.f32 %v4876_v50, %v3166_v45 }
 0x9f8   : > { %3115 = vmatpush.msrb.mxu3 %v3114_v54  ;;  %3056 = vmatpush.msrb.mxu2 %v4683_v43 }
 0x9f9   : > { %3009 = vmatpush.msrb.mxu1 %v4588_v26  ;;  %2986 = vmatpush.msrb.mxu0 %v2867_v22  ;;  %v3132_v26 = vand.u32 4294901760, %v3131_v58  ;;  %v3039_v22 = vld [vmem:[%s4021_s27 + $0x20] sm:$0xff]  ;;  %v4899_v58 = vand.u32 4294901760, %v3035_v1  ;;  %v3168_v38 = vand.u32 4294901760, %v3167_v56 }
 0x9fa   : > { %3121 = vmatpush.msrb.mxu3 %v3120_v23  ;;  %3058 = vmatpush.msrb.mxu2 %v4685_v47  ;;  %v4852_v19 = vand.u32 4294901760, %v3039_v22  ;;  %v3177_v23 = vsub.f32 %v3036_v60, %v4888_v0 }
 0x9fb   : > { %3011 = vmatpush.msrb.mxu1 %v4593_v32  ;;  %2990 = vmatpush.msrb.mxu0 %v2873_v20  ;;  %v3144_v32 = vand.u32 4294901760, %v3143_v3  ;;  %v3183_v3 = vsub.f32 %v3035_v1, %v4899_v58 }
 0x9fc   : > { %2992 = vmatmul.f32.vlgmr.msrb.gmra.mxu0 %v4681_v39  ;;  %3127 = vmatpush.msrb.mxu3 %v3126_v24  ;;  %v4863_v36 = vsub.f32 %v3039_v22, %v4852_v19  ;;  %v3172_v24 = vand.u32 4294901760, %v4892_v42 }
 0x9fd   : > { %3013 = vmatpush.msrb.mxu1 %v4595_v34  ;;  %3195 = vmatpush.msra.mxu0 %v4690_v48  ;;  %v3041_v34 = vld [vmem:[%s4021_s27 + $0x30] sm:$0xff] }
 0x9fe   : > { %3060 = vmatpush.msrb.mxu2 %v4695_v51  ;;  %3133 = vmatpush.msrb.mxu3 %v3132_v26  ;;  %v3160_v12 = vand.u32 4294901760, %v4863_v36  ;;  %v3178_v26 = vand.u32 4294901760, %v3177_v23 }
 0x9ff   : > { %3015 = vmatpush.msrb.mxu1 %v4597_v40  ;;  %3198 = vmatpush.msra.mxu0 %v4693_v49  ;;  %v4837_v40 = vand.u32 4294901760, %v3041_v34 }
 0xa00   : > { %3062 = vmatpush.msrb.mxu2 %v4713_v18  ;;  %3139 = vmatpush.msrb.mxu3 %v3138_v4  ;;  %v3161_v21 = vsub.f32 %v4863_v36, %v3160_v12  ;;  %v3173_v4 = vsub.f32 %v4892_v42, %v3172_v24 }
 0xa01   : > { %3017 = vmatpush.msrb.mxu1 %v4612_v33  ;;  %3201 = vmatpush.msra.mxu0 %v4705_v11  ;;  %v3040_v33 = vld [vmem:[%s4021_s27 + $0x28] sm:$0xff] }
 0xa02   : > { %3064 = vmatpush.msrb.mxu2 %v4720_v31  ;;  %3145 = vmatpush.msrb.mxu3 %v3144_v32  ;;  %v4843_v7 = vand.u32 4294901760, %v3040_v33  ;;  %v3162_v54 = vand.u32 4294901760, %v3161_v21  ;;  %v3179_v32 = vsub.f32 %v3177_v23, %v3178_v26 }
 0xa03   : > { %3019 = vmatpush.msrb.mxu1 %v4623_v59  ;;  %3204 = vmatpush.msra.mxu0 %v4711_v28  ;;  %v4841_v59 = vsub.f32 %v3041_v34, %v4837_v40  ;;  %v3184_v34 = vand.u32 4294901760, %v3183_v3 }
 0xa04   : > { %3021 = vmatmul.f32.vlgmr.msrb.gmra.mxu1 %v4681_v39  ;;  %3066 = vmatpush.msrb.mxu2 %v4754_v29  ;;  %v4850_v39 = vsub.f32 %v3040_v33, %v4843_v7  ;;  %v3174_v33 = vand.u32 4294901760, %v3173_v4  ;;  %v3180_v22 = vand.u32 4294901760, %v3179_v32 }
 0xa05   : > { %3248 = vmatpush.msra.mxu1 %v4674_v16  ;;  %3207 = vmatpush.msra.mxu0 %v4729_v6  ;;  %v3148_v20 = vand.u32 4294901760, %v4841_v59  ;;  %v3185_v55 = vsub.f32 %v3183_v3, %v3184_v34 }
 0xa06   : > { %3068 = vmatpush.msrb.mxu2 %v4756_v30  ;;  %v3154_v61 = vand.u32 4294901760, %v4850_v39 }
 0xa07   : > { %3250 = vmatpush.msra.mxu1 %v4676_v37  ;;  %3210 = vmatpush.msra.mxu0 %v4742_v13  ;;  %v3149_v63 = vsub.f32 %v4841_v59, %v3148_v20 }
 0xa08   : > { %3070 = vmatpush.msrb.mxu2 %v4837_v40  ;;  %v3155_v9 = vsub.f32 %v4850_v39, %v3154_v61 }
 0xa09   : > { %3252 = vmatpush.msra.mxu1 %v4683_v43  ;;  %3213 = vmatpush.msra.mxu0 %v4748_v15  ;;  %v3150_v8 = vand.u32 4294901760, %v3149_v63  ;;  %v3186_v63 = vand.u32 4294901760, %v3185_v55 }
 0xa0a   : > { %3072 = vmatpush.msrb.mxu2 %v4843_v7  ;;  %v3156_v14 = vand.u32 4294901760, %v3155_v9 }
 0xa0b   : > { %3254 = vmatpush.msra.mxu1 %v4685_v47  ;;  %3216 = vmatpush.msra.mxu0 %v4765_v10 }
 0xa0c   : > { %3074 = vmatpush.msrb.mxu2 %v4852_v19  ;;  %3151 = vmatpush.msrb.mxu3 %v3150_v8  ;;  %v3034_v8 = vld [vmem:[#allocation4] sm:$0xff] }
 0xa0d   : > { %3256 = vmatpush.msra.mxu1 %v4695_v51  ;;  %3219 = vmatpush.msra.mxu0 %v4775_v52 }
 0xa0e   : > { %3076 = vmatpush.msrb.mxu2 %v4865_v41  ;;  %3157 = vmatpush.msrb.mxu3 %v3156_v14 }
 0xa0f   : > { %3258 = vmatpush.msra.mxu1 %v4713_v18  ;;  %3222 = vmatpush.msra.mxu0 %v4841_v59 }
 0xa10   : > { %3078 = vmatpush.msrb.mxu2 %v4880_v25  ;;  %3163 = vmatpush.msrb.mxu3 %v3162_v54 }
 0xa11   : > { %3260 = vmatpush.msra.mxu1 %v4720_v31  ;;  %3225 = vmatpush.msra.mxu0 %v4850_v39 }
 0xa12   : > { %3080 = vmatpush.msrb.mxu2 %v4888_v0  ;;  %3169 = vmatpush.msrb.mxu3 %v3168_v38 }
 0xa13   : > { %3262 = vmatpush.msra.mxu1 %v4754_v29  ;;  %3228 = vmatpush.msra.mxu0 %v4863_v36 }
 0xa14   : > { %3082 = vmatpush.msrb.mxu2 %v4899_v58  ;;  %3175 = vmatpush.msrb.mxu3 %v3174_v33 }
 0xa15   : > { %3264 = vmatpush.msra.mxu1 %v4756_v30  ;;  %3231 = vmatpush.msra.mxu0 %v4876_v50 }
 0xa16   : > { %3289 = vmatpush.msra.mxu2 %v3094_v46  ;;  %3181 = vmatpush.msrb.mxu3 %v3180_v22 }
 0xa17   : > { %3266 = vmatpush.msra.mxu1 %v4837_v40  ;;  %3234 = vmatpush.msra.mxu0 %v4892_v42 }
 0xa18   : > { %3293 = vmatpush.msra.mxu2 %v3100_v17  ;;  %3187 = vmatpush.msrb.mxu3 %v3186_v63 }
 0xa19   : > { %3268 = vmatpush.msra.mxu1 %v4843_v7  ;;  %3237 = vmatpush.msra.mxu0 %v3177_v23 }
 0xa1a   : > { %3297 = vmatpush.msra.mxu2 %v3106_v5  ;;  %3356 = vmatpush.msra.mxu3 %v4674_v16  ;;  %v3691_v16 = vld [vmem:[%s604_s15] ss:$0 sm:$0xff] }
 0xa1b   : > { %3270 = vmatpush.msra.mxu1 %v4852_v19  ;;  %3240 = vmatpush.msra.mxu0 %v3183_v3 }
 0xa1c   : > { %3301 = vmatpush.msra.mxu2 %v3112_v57  ;;  %3358 = vmatpush.msra.mxu3 %v4676_v37 }
 0xa1d   : > { %3272 = vmatpush.msra.mxu1 %v4865_v41 }
 0xa1e   : > { %3305 = vmatpush.msra.mxu2 %v3118_v27  ;;  %3360 = vmatpush.msra.mxu3 %v4683_v43 }
 0xa1f   : > { %3274 = vmatpush.msra.mxu1 %v4880_v25 }
 0xa20   : > { %3309 = vmatpush.msra.mxu2 %v3124_v35  ;;  %3362 = vmatpush.msra.mxu3 %v4685_v47 }
 0xa21   : > { %3276 = vmatpush.msra.mxu1 %v4888_v0 }
 0xa22   : > { %3313 = vmatpush.msra.mxu2 %v3130_v44  ;;  %3364 = vmatpush.msra.mxu3 %v4695_v51 }
 0xa23   : > { %3278 = vmatpush.msra.mxu1 %v4899_v58 }
 0xa24   : > { %3317 = vmatpush.msra.mxu2 %v3136_v53  ;;  %3366 = vmatpush.msra.mxu3 %v4713_v18 }
 0xa26   : > { %3321 = vmatpush.msra.mxu2 %v3142_v2  ;;  %3368 = vmatpush.msra.mxu3 %v4720_v31 }
 0xa28   : > { %3325 = vmatpush.msra.mxu2 %v3148_v20  ;;  %3370 = vmatpush.msra.mxu3 %v4754_v29 }
 0xa2a   : > { %3329 = vmatpush.msra.mxu2 %v3154_v61  ;;  %3372 = vmatpush.msra.mxu3 %v4756_v30 }
 0xa2c   : > { %3333 = vmatpush.msra.mxu2 %v3160_v12  ;;  %3374 = vmatpush.msra.mxu3 %v4837_v40 }
 0xa2e   : > { %3337 = vmatpush.msra.mxu2 %v3166_v45  ;;  %3376 = vmatpush.msra.mxu3 %v4843_v7 }
 0xa30   : > { %3341 = vmatpush.msra.mxu2 %v3172_v24  ;;  %3378 = vmatpush.msra.mxu3 %v4852_v19 }
 0xa32   : > { %3345 = vmatpush.msra.mxu2 %v3178_v26  ;;  %3380 = vmatpush.msra.mxu3 %v4865_v41 }
 0xa34   : > { %3349 = vmatpush.msra.mxu2 %v3184_v34  ;;  %3382 = vmatpush.msra.mxu3 %v4880_v25 }
 0xa36   : > { %3384 = vmatpush.msra.mxu3 %v4888_v0 }
 0xa38   : > { %3386 = vmatpush.msra.mxu3 %v4899_v58 }
 0xa6d   : > { %v2818_v37 = vpop.f32.mrf.mxu0 }
 0xa6e   : > { %v2819_v43 = vadd.f32 %v3691_v16, %v2818_v37 }
 0xa71   : > { %v2879_v47 = vpop.f32.mrf.mxu1  ;;  %v2948_v11 = vpop.f32.mrf.mxu3 }
 0xa72   : > { %v2880_v49 = vadd.f32 %v2879_v47, %v2819_v43 }
 0xa73   : > { %v2917_v48 = vpop.f32.mrf.mxu2 }
 0xa74   : > { %v2918_v51 = vadd.f32 %v2917_v48, %v2880_v49 }
 0xa76   : > { %v2949_v46 = vadd.f32 %v2948_v11, %v2918_v51 }
 0xa79   : > { %v2993_v17 = vpop.f32.mrf.mxu0 }
 0xa7a   : > { %v2994_v28 = vadd.f32 %v2993_v17, %v2949_v46 }
 0xa81   : > { %v3022_v18 = vpop.f32.mrf.mxu1 }
 0xa82   : > { %v3023_v31 = vadd.f32 %v3022_v18, %v2994_v28 }
 0xa84   : > { %v3026_v5 = vmul.f32 0.044715, %v3023_v31  ;;  %v3025_v29 = vmul.f32 0.5, %v3023_v31 }
 0xa86   : > { %v3027_v6 = vmul.f32 %v3026_v5, %v3023_v31 }
 0xa88   : > { %v3028_v57 = vmul.f32 %v3027_v6, %v3023_v31 }
 0xa8a   : > { %v3029_v13 = vadd.f32 %v3028_v57, %v3023_v31 }
 0xa8c   : > { %v3030_v15 = vmul.f32 0.7978846, %v3029_v13 }
 0xa8e   : > { %3692 = vtanh.f32 %v3030_v15 }
 0xa94   : > { %v3693_v27 = vpop.eup %3692 }
 0xa95   : > { %v3032_v30 = vadd.f32 1.0, %v3693_v27 }
 0xa97   : > { %v3033_v35 = vmul.f32 %v3032_v30, %v3025_v29 }
 0xa99   : > { %v3083_v10 = vand.u32 4294901760, %v3033_v35 }
 0xa9b   : > { %3189 = vmatmul.f32.vlgmr.msrb.gmra.mxu3 %v3083_v10  ;;  %v3084_v44 = vsub.f32 %v3033_v35, %v3083_v10 }
 0xa9d   : > { %3243 = vmatmul.f32.vlgmr.msra.gmra.mxu0 %v3084_v44  ;;  %v3085_v52 = vand.u32 4294901760, %v3084_v44 }
 0xa9f   : > { %3282 = vmatmul.f32.vlgmr.msra.gmra.mxu1 %v3085_v52  ;;  %v3086_v53 = vsub.f32 %v3084_v44, %v3085_v52 }
 0xaa1   : > { %v3087_v2 = vand.u32 4294901760, %v3086_v53 }
 0xaa3   : > { %3088 = vmatmul.f32.vlgmr.msrb.gmra.mxu2 %v3087_v2  ;;  %3388 = vmatmul.f32.vlgmr.msra.gmra.mxu3 %v3083_v10 }
 0xaab   : > { %3351 = vmatmul.f32.vlgmr.msra.gmra.mxu2 %v3083_v10 }
 0xb1a   : > { %v3244_v20 = vpop.f32.mrf.mxu0 }
 0xb1c   : > { %v3283_v19 = vpop.f32.mrf.mxu1 }
 0xb1e   : > { %v3190_v40 = vpop.f32.mrf.mxu3 }
 0xb26   : > { %v3089_v59 = vpop.f32.mrf.mxu2  ;;  %v3389_v62 = vpop.f32.mrf.mxu3 }
 0xb27   : > { %v3191_v7 = vadd.f32 %v3190_v40, %v3089_v59 }
 0xb29   : > { %v3245_v39 = vadd.f32 %v3244_v20, %v3191_v7 }
 0xb2b   : > { %v3284_v61 = vadd.f32 %v3283_v19, %v3245_v39 }
 0xb2e   : > { %v3352_v36 = vpop.f32.mrf.mxu2 }
 0xb2f   : > { %v3353_v41 = vadd.f32 %v3352_v36, %v3284_v61 }
 0xb31   : > { %v3390_v9 = vadd.f32 %v3389_v62, %v3353_v41  ;;  %3397 = sbr.rel (%p3556_p7) target bundleno = 2880 (0xb40), region = 122 }
 0xb33   : > { %v3392_v12 = vadd.f32 %v3390_v9, %v3034_v8 }
 0xb35   : > { %3393 = vst.msk [vmem:[#allocation4] sm:$0xff] %vm2784_vm0, %v3392_v12 }
 0xb36   : > { %v3694_v25 = vld [vmem:[%s5068_s17] ss:$0 sm:$0xff] }
 0xb3c   : > { %v3398_v50 = vld [vmem:[#allocation4] sm:$0xff] }
 0xb3d   : > { %v3403_v60 = vadd.f32 %v3694_v25, %v3398_v50 }
 0xb3f   : > { %3404 = vst.msk [vmem:[%s593_s10] sm:$0xff] %vm2784_vm0, %v3403_v60 }
 0xb40 PF: > { %s3558_s22 = sshll.u32 %s3793_s19, 3  ;;  %s5070_s18 = sld [smem:[#allocation26_spill]] }
 0xb41   : > { %s3418_s9 = sshll.u32 %s593_s10, 4  ;;  %s5072_s16 = sand.u32 1, %s3773_s30   ;;  %s3419_s9 = int_to_ptr.vmem [resolvable:$true] %s3418_s9 }
 0xb42   : > { %s3406_s21 = scalar_lea.sflag [#allocation7], %s5072_s16 }
 0xb46   : > { %s5071_s26 = smov %s5070_s18  ;;  %s3416_s23 = scalar_lea.hbm %s5070_s18, %s3558_s22 }
 0xb47   : > { %s3420_s24 = sshll.u32 %s3416_s23, 4  ;;  %s3715_s27 = scalar_lea.hbm %s5071_s26, 16  ;;  %s3421_s24 = int_to_ptr.hbm [resolvable:$true] %s3420_s24 }
 0xb48   : > { %s3709_s14 = sshra.s32 %s3421_s24, 4  ;;  %s3710_s14 = int_to_ptr.hbm [resolvable:$true] %s3709_s14 }
 0xb49   : > { %s3711_s29 = scalar_lea.hbm %s3710_s14, 8  ;;  %p3716_p13 = scmp.lt.s32.totalorder %s3710_s14, %s5071_s26 }
 0xb4a   : > { %p3712_p8 = scmp.ne.s32.totalorder %s3710_s14, %s3711_s29  ;;  %p3717_p0 = scmp.lt.s32.totalorder %s3715_s27, %s3711_s29 }
 0xb4c   : > { %p3713_p9 = pnand %p3712_p8, %p3970_p10  ;;  %p3718_p1 = por %p3717_p0, %p3716_p13 }
 0xb4e   : > { %p3714_p11 = pneg %p3713_p9 }
 0xb50   : > { %p3719_p2 = pnand %p3718_p1, %p3714_p11 }
 0xb52   : > { %3722 = shalt.err (!%p3719_p2)
}
 0xb53   : > { %3561 = dma.vmem_to_hbm [thread:$0]  (%p3970_p10), %s3419_s9, 128, %s3421_s24, %s3406_s21  }
 0xb54 PF: > { %s5073_s8 = sld [smem:[#allocation14_spill]] }
 0xb55   : > { %s5074_s10 = sld [smem:[#allocation9_spill]] }
 0xb5a   : > { %p3567_p3 = scmp.ge.s32.totalorder %s5073_s8, 2 }
 0xb5b   : > { %s3432_s22 = sand.u32 1, %s5074_s10  }
 0xb5c   : > { %p3564_p4 = pnand %p3567_p3, %p3977_p12  ;;  %s3433_s25 = scalar_lea.sflag [#allocation7], %s3432_s22 }
 0xb5e   : > { %p3565_p5 = pneg %p3564_p4 }
 0xb60   : > { %3764 = dma.done.wait (%p3565_p5), %s3433_s25, 128  }
 0xb61   : > { %3766 = vsyncadd (%p3565_p5), %s3433_s25, 4294967168  ;;  %s27_s22 = sadd.s32 1, %s5073_s8   ;;  %s5076_s28 = sld [smem:[#allocation10_spill]] }
 0xb62   : > { %p24_p6 = scmp.ge.s32.totalorder %s27_s22, 6   ;;  %s5077_s15 = sld [smem:[#allocation19_spill]] }
 0xb63   : > { %s5078_s16 = sld [smem:[#allocation11_spill]]  ;;  %s5084_s29 = smov %s3773_s30 }
 0xb64   : > { %s5079_s17 = sld [smem:[#allocation17_spill]]  ;;  %26 = sbr.rel (!%p24_p6) target bundleno = 13 (0xd), region = 174 }
 0xb65   : > { %s5080_s18 = sld [smem:[#allocation12_spill]] }
 0xb66   : > { %s5081_s19 = sld [smem:[#allocation13_spill]] }
 0xb67   : > { %s5082_s20 = sld [smem:[#allocation15_spill]]  ;;  %s5085_s30 = smov %s5076_s28 }
 0xb68   : > { %s5083_s21 = sld [smem:[#allocation16_spill]] }
 0xb69   :  { %3439 = vsyncpa [#allocation7], 1 }
 0xb6a   :  { %3441 = vsyncpa [#allocation7 + $0x1], 1 }

</bundles_post_ra>
